<compile_context>
chip_gen: v7x
topology: tpu7x:2x2x1
jax: 0.10.0
libtpu: 0.0.40
codegen_flags: <defaults>
</compile_context>

<pallas_src>
import functools
import math

import jax
import jax.numpy as jnp
from jax.experimental import pallas as pl
from jax.experimental.pallas import tpu as pltpu

BN_EPS = 1e-5
LEAKY_SLOPE = 0.1  # madry/mixmatch WideResNet uses nn.LeakyReLU(0.1)


# --------------------------- fused conv kernel --------------------------------

def _fused_conv_kernel(*refs, H, W, Ho, Wo, Cin, stride, apply_bn_act,
                       res_mode, compute_dtype):
    """(BN+LeakyReLU) -> 3x3 conv (stride s) [+ residual | + 1x1 shortcut (+act)].

    Grid: (b, co).  At co == 0 the activated input is gathered once into a packed
    im2col scratch col: (Ho*Wo, 9*Cin); every (b, co) step then does a single MXU
    matmul against the (9*Cin, Cout_tile) packed weight.

    refs, in order:
      src   : stride==1 -> (1, H, W, Cin) raw input (no HBM pad)
              stride>1  -> (s*s, Hs, Ws, Cin) spatial phases of the zero-padded input
      scale, bias : (1, 1, Cin) f32                 (only if apply_bn_act)
      mask  : (s*s, Hs, Ws, 1) f32                  (only if apply_bn_act and stride>1)
      wp    : (9*Cin, Cout_tile) packed conv weight (K order = ky, kx, cin)
      res   : (1, Ho, Wo, Cout_tile)                (res_mode == "identity")
      xs, ws[, ss, sb]                              (res_mode == "conv"/"conv_act")
      o     : (1, Ho, Wo, Cout_tile)
    scratch:
      col   : VMEM (Ho*Wo, 9*Cin)
      ap    : VMEM (H+2, W+2, Cin)                  (stride == 1 only)
    """
    if stride == 1:
        *in_refs, o_ref, col_ref, ap_ref = refs
    else:
        *in_refs, o_ref, col_ref = refs
        ap_ref = None

    it = iter(in_refs)
    src_ref = next(it)
    if apply_bn_act:
        scale_ref = next(it)
        bias_ref = next(it)
        mask_ref = next(it) if stride > 1 else None
    wp_ref = next(it)
    if res_mode == "identity":
        res_ref = next(it)
    elif res_mode in ("conv", "conv_act"):
        xs_ref = next(it)
        ws_ref = next(it)
        if res_mode == "conv_act":
            ss_ref = next(it)
            sb_ref = next(it)

    co = pl.program_id(1)

    # ---- build the packed im2col matrix once per batch element -------------------
    @pl.when(co == 0)
    def _build_col():
        if stride == 1:
            x = src_ref[0]                                    # (H, W, Cin)
            if apply_bn_act:
                a = x.astype(jnp.float32) * scale_ref[...] + bias_ref[...]
                a = jnp.where(a > 0, a, LEAKY_SLOPE * a).astype(compute_dtype)
            else:
                a = x                                          # raw-x path
            # Zero-bordered VMEM scratch: halo never sees BN bias, so no mask math.
            zr = jnp.zeros((1, W + 2, Cin), compute_dtype)
            zc = jnp.zeros((H + 2, 1, Cin), compute_dtype)
            ap_ref[0:1] = zr
            ap_ref[H + 1:H + 2] = zr
            ap_ref[:, 0:1, :] = zc
            ap_ref[:, W + 1:W + 2, :] = zc
            ap_ref[1:H + 1, 1:W + 1, :] = a
            pieces = []
            for ky in range(3):
                slab = ap_ref[ky:ky + Ho]                      # (Ho, W+2, Cin); row offset is free
                for kx in range(3):
                    # TODO(synk): replace the kx>0 sublane-offset slices with pltpu.roll
                    # (XLU slot) + trailing-zero halo to kill the remaining relayout copy.
                    pieces.append(slab[:, kx:kx + Wo, :].reshape(Ho * Wo, Cin))
            col_ref[...] = jnp.concatenate(pieces, axis=-1)    # (Ho*Wo, 9*Cin)
        else:
            s = stride
            phases = []
            for p in range(s * s):
                v = src_ref[p]                                 # (Hs, Ws, Cin)
                if apply_bn_act:
                    a = v.astype(jnp.float32) * scale_ref[...] + bias_ref[...]
                    a = jnp.where(a > 0, a, LEAKY_SLOPE * a)
                    # channel-invariant halo mask (single VPU multiply, lane-broadcast)
                    a = (a * mask_ref[p]).astype(compute_dtype)
                else:
                    a = v                                      # raw-x path: pad zeros already valid
                phases.append(a)
            pieces = []
            for ky in range(3):
                for kx in range(3):
                    p = (ky % s) * s + (kx % s)
                    qy, qx = ky // s, kx // s
                    pieces.append(
                        phases[p][qy:qy + Ho, qx:qx + Wo, :].reshape(Ho * Wo, Cin))
            col_ref[...] = jnp.concatenate(pieces, axis=-1)    # (Ho*Wo, 9*Cin)

    # ---- one packed MXU matmul per (b, co): K = 9*Cin -----------------------------
    y = jnp.dot(col_ref[...], wp_ref[...], preferred_element_type=jnp.float32)

    if res_mode in ("conv", "conv_act"):
        xs = xs_ref[0]                                         # (Ho, Wo, Cs)
        cs = xs.shape[-1]
        if res_mode == "conv_act":
            xf = xs.astype(jnp.float32) * ss_ref[...] + sb_ref[...]
            xs = jnp.where(xf > 0, xf, LEAKY_SLOPE * xf).astype(compute_dtype)
        y = y + jnp.dot(xs.reshape(Ho * Wo, cs), ws_ref[...],
                        preferred_element_type=jnp.float32)

    y = y.reshape(Ho, Wo, -1)
    if res_mode == "identity":
        y = y + res_ref[0].astype(jnp.float32)                 # add in 3-D (no residual reshape)
    o_ref[0] = y.astype(o_ref.dtype)


# --------------------------- wrapper -------------------------------------------

def _pick_cout_tile(cout):
    """Cout tile: keep whole if small; else largest 128-multiple divisor <= 512."""
    if cout <= 512:
        return cout
    for t in (512, 256, 128):
        if cout % t == 0:
            return t
    return cout
    # TODO(synk): pad Cout to the next 128 multiple (WRN 160/320) for lane-dense stores.


def fused_conv3x3(x, w_hwio, *, stride=1, bn=None, residual=None, shortcut=None,
                  compute_dtype=jnp.bfloat16, out_dtype=None):
    """y = conv3x3(act(bn(x)) if bn else x, stride) [+ residual | + 1x1 shortcut].

    x: (B, H, W, Cin) NHWC.  w_hwio: (3, 3, Cin, Cout).
    bn: (scale, bias) per-channel f32 vectors, or None.
    residual: (B, Ho, Wo, Cout) tensor to add, or None.
    shortcut: dict(x=(B,Ho,Wo,Cs), w=(1,1,Cs,Cout) or (Cs,Cout), bn=(scale,bias)|None).
    """
    B, H, W, Cin = x.shape
    Cout = w_hwio.shape[-1]
    s = int(stride)

    if s == 1:
        Ho, Wo = H, W
        P = 1
        src = x.astype(compute_dtype)                         # raw NHWC, no HBM pad
        src_spec = pl.BlockSpec((1, H, W, Cin), lambda b, co: (b, 0, 0, 0))
    else:
        # WRN spatial dims are even; the phase split needs (H+2) % s == 0.
        assert (H + 2) % s == 0 and (W + 2) % s == 0, (H, W, s)
        Ho = (H + 2 - 3) // s + 1
        Wo = (W + 2 - 3) // s + 1
        Hs, Ws = (H + 2) // s, (W + 2) // s
        P = s * s
        xp = jnp.pad(x.astype(compute_dtype), ((0, 0), (1, 1), (1, 1), (0, 0)))
        # Split into s*s spatial phases so strided taps become contiguous slices.
        src = (xp.reshape(B, Hs, s, Ws, s, Cin)
                 .transpose(0, 2, 4, 1, 3, 5)
                 .reshape(B * P, Hs, Ws, Cin))
        src_spec = pl.BlockSpec((P, Hs, Ws, Cin), lambda b, co: (b, 0, 0, 0))

    t_cout = _pick_cout_tile(Cout)
    n_co = Cout // t_cout

    args = [src]
    in_specs = [src_spec]

    apply_bn_act = bn is not None
    if apply_bn_act:
        scale, bias = bn
        args += [scale.reshape(1, 1, Cin).astype(jnp.float32),
                 bias.reshape(1, 1, Cin).astype(jnp.float32)]
        in_specs += [pl.BlockSpec((1, 1, Cin), lambda b, co: (0, 0, 0)),
                     pl.BlockSpec((1, 1, Cin), lambda b, co: (0, 0, 0))]
        if s > 1:
            # channel-invariant interior mask (zero the halo after BN+act), (P, Hs, Ws, 1)
            ry = (jnp.arange(P) // s)[:, None, None]
            rx = (jnp.arange(P) % s)[:, None, None]
            rows = jnp.arange(Hs)[None, :, None] * s + ry      # (P, Hs, 1)
            cols = jnp.arange(Ws)[None, None, :] * s + rx      # (P, 1, Ws)
            m = (((rows >= 1) & (rows <= H)).astype(jnp.float32)
                 * ((cols >= 1) & (cols <= W)).astype(jnp.float32))
            args.append(m[..., None])
            in_specs.append(pl.BlockSpec((P, Hs, Ws, 1), lambda b, co: (0, 0, 0, 0)))

    # packed conv weight: (3,3,Cin,Cout) -> (9*Cin, Cout); K order = (ky, kx, cin)
    args.append(w_hwio.astype(compute_dtype).reshape(9 * Cin, Cout))
    in_specs.append(pl.BlockSpec((9 * Cin, t_cout), lambda b, co: (0, co)))
    # TODO(synk): single-buffer the grid-invariant small inputs (scale/bias/mask) with
    # pipeline_mode=pl.Buffered(1) once VMEM headroom matters.

    res_mode = "none"
    if residual is not None:
        res_mode = "identity"
        assert residual.shape == (B, Ho, Wo, Cout)
        args.append(residual.astype(compute_dtype))
        in_specs.append(pl.BlockSpec((1, Ho, Wo, t_cout), lambda b, co: (b, 0, 0, co)))
    elif shortcut is not None:
        xs = shortcut["x"].astype(compute_dtype)
        Cs = xs.shape[-1]
        assert xs.shape == (B, Ho, Wo, Cs)
        args.append(xs)
        in_specs.append(pl.BlockSpec((1, Ho, Wo, Cs), lambda b, co: (b, 0, 0, 0)))
        args.append(shortcut["w"].reshape(Cs, Cout).astype(compute_dtype))
        in_specs.append(pl.BlockSpec((Cs, t_cout), lambda b, co: (0, co)))
        if shortcut.get("bn") is not None:
            res_mode = "conv_act"
            ss, sb = shortcut["bn"]
            args += [ss.reshape(1, 1, Cs).astype(jnp.float32),
                     sb.reshape(1, 1, Cs).astype(jnp.float32)]
            in_specs += [pl.BlockSpec((1, 1, Cs), lambda b, co: (0, 0, 0)),
                         pl.BlockSpec((1, 1, Cs), lambda b, co: (0, 0, 0))]
        else:
            res_mode = "conv"

    out_dtype = compute_dtype if out_dtype is None else out_dtype
    kernel = functools.partial(
        _fused_conv_kernel, H=H, W=W, Ho=Ho, Wo=Wo, Cin=Cin, stride=s,
        apply_bn_act=apply_bn_act, res_mode=res_mode, compute_dtype=compute_dtype)

    scratch = [pltpu.VMEM((Ho * Wo, 9 * Cin), compute_dtype)]   # packed im2col
    if s == 1:
        scratch.append(pltpu.VMEM((H + 2, W + 2, Cin), compute_dtype))  # zero-bordered act

    # TODO(synk): for spatial dims >> 32 add a "parallel" output-row grid axis as well.
    return pl.pallas_call(
        kernel,
        out_shape=jax.ShapeDtypeStruct((B, Ho, Wo, Cout), out_dtype),
        grid=(B, n_co),
        in_specs=in_specs,
        out_specs=pl.BlockSpec((1, Ho, Wo, t_cout), lambda b, co: (b, 0, 0, co)),
        scratch_shapes=scratch,
        compiler_params=pltpu.CompilerParams(
            dimension_semantics=("parallel", "arbitrary"),
            vmem_limit_bytes=32 * 1024 * 1024),
    )(*args)


# --------------------------- BasicBlock / NetworkBlock -------------------------

def _fold_bn(gamma, beta, mean, var):
    scale = gamma / jnp.sqrt(var + BN_EPS)
    return scale, beta - mean * scale


def basic_block_apply(x, p, stride, equal_in_out, activate_before_residual,
                      compute_dtype=jnp.bfloat16):
    """PyTorch BasicBlock.forward (inference, dropRate=0) as exactly 2 fused kernels."""
    bn1 = _fold_bn(p["bn1_gamma"], p["bn1_beta"], p["bn1_mean"], p["bn1_var"])
    bn2 = _fold_bn(p["bn2_gamma"], p["bn2_beta"], p["bn2_mean"], p["bn2_var"])
    # TODO(synk): F.dropout for dropRate > 0 not implemented (inference, dropRate=0.0).

    if equal_in_out:
        # conv1(act(bn1(x))); conv2(act(bn2(h))) + x
        h = fused_conv3x3(x, p["w1"], stride=stride, bn=bn1,
                          compute_dtype=compute_dtype)
        return fused_conv3x3(h, p["w2"], stride=1, bn=bn2, residual=x,
                             compute_dtype=compute_dtype)

    xs = x if stride == 1 else x[:, ::stride, ::stride, :]   # 1x1-shortcut input grid
    if activate_before_residual:
        # x <- act(bn1(x)); conv1 and the shortcut both see the activated x
        # (shortcut activation is recomputed inside the conv2 kernel).
        h = fused_conv3x3(x, p["w1"], stride=stride, bn=bn1,
                          compute_dtype=compute_dtype)
        sc = dict(x=xs, w=p["ws"], bn=bn1)
    else:
        # torch feeds the RAW x into conv1 and the shortcut in this branch.
        h = fused_conv3x3(x, p["w1"], stride=stride, bn=None,
                          compute_dtype=compute_dtype)
        sc = dict(x=xs, w=p["ws"], bn=None)
    return fused_conv3x3(h, p["w2"], stride=1, bn=bn2, shortcut=sc,
                         compute_dtype=compute_dtype)


def init_basic_block_params(key, cin, cout):
    ks = jax.random.split(key, 11)

    def conv_w(k, kh, kw, ci, co):
        # PyTorch WRN init: N(0, sqrt(2 / (kh*kw*out_channels))); stored as HWIO.
        std = math.sqrt(2.0 / (kh * kw * co))
        return std * jax.random.normal(k, (kh, kw, ci, co), jnp.float32)

    p = {
        "bn1_gamma": 1.0 + 0.1 * jax.random.normal(ks[0], (cin,), jnp.float32),
        "bn1_beta": 0.1 * jax.random.normal(ks[1], (cin,), jnp.float32),
        "bn1_mean": 0.1 * jax.random.normal(ks[2], (cin,), jnp.float32),
        "bn1_var": 1.0 + 0.1 * jnp.abs(jax.random.normal(ks[3], (cin,), jnp.float32)),
        "w1": conv_w(ks[4], 3, 3, cin, cout),
        "bn2_gamma": 1.0 + 0.1 * jax.random.normal(ks[5], (cout,), jnp.float32),
        "bn2_beta": 0.1 * jax.random.normal(ks[6], (cout,), jnp.float32),
        "bn2_mean": 0.1 * jax.random.normal(ks[7], (cout,), jnp.float32),
        "bn2_var": 1.0 + 0.1 * jnp.abs(jax.random.normal(ks[8], (cout,), jnp.float32)),
        "w2": conv_w(ks[9], 3, 3, cout, cout),
    }
    if cin != cout:
        p["ws"] = conv_w(ks[10], 1, 1, cin, cout)
    return p


class NetworkBlockPallas:
    """NetworkBlock: sequential stack of BasicBlocks, fused Pallas implementation."""

    def __init__(self, key, nb_layers, in_planes, out_planes, stride,
                 dropRate=0.0, activate_before_residual=False,
                 compute_dtype=jnp.bfloat16):
        assert dropRate == 0.0  # TODO(synk): dropout not implemented (inference).
        self.compute_dtype = compute_dtype
        self.blocks = []
        for i in range(nb_layers):
            cin = in_planes if i == 0 else out_planes
            s = stride if i == 0 else 1
            abr = activate_before_residual if i == 0 else False
            key, sub = jax.random.split(key)
            self.blocks.append(dict(
                params=init_basic_block_params(sub, cin, out_planes),
                stride=s, equal_in_out=(cin == out_planes), abr=abr))

    def __call__(self, x_nchw):
        x = jnp.transpose(x_nchw, (0, 2, 3, 1)).astype(self.compute_dtype)  # -> NHWC
        for b in self.blocks:
            x = basic_block_apply(x, b["params"], b["stride"], b["equal_in_out"],
                                  b["abr"], self.compute_dtype)
        return jnp.transpose(x.astype(jnp.float32), (0, 3, 1, 2))           # -> NCHW


# --------------------------- pure-JAX reference (same mixed precision) ---------

def _ref_fused_conv3x3(x, w, stride, bn, residual, shortcut, cd):
    a = x.astype(cd)
    if bn is not None:
        scale, bias = bn
        af = a.astype(jnp.float32) * scale + bias
        a = jnp.where(af > 0, af, LEAKY_SLOPE * af).astype(cd)
    out = jax.lax.conv_general_dilated(
        a, w.astype(cd), (stride, stride), [(1, 1), (1, 1)],
        dimension_numbers=("NHWC", "HWIO", "NHWC"),
        preferred_element_type=jnp.float32)
    if residual is not None:
        out = out + residual.astype(cd).astype(jnp.float32)
    if shortcut is not None:
        xs = shortcut["x"].astype(cd)
        if shortcut.get("bn") is not None:
            ss, sb = shortcut["bn"]
            xf = xs.astype(jnp.float32) * ss + sb
            xs = jnp.where(xf > 0, xf, LEAKY_SLOPE * xf).astype(cd)
        out = out + jax.lax.conv_general_dilated(
            xs, shortcut["w"].reshape(1, 1, xs.shape[-1], -1).astype(cd),
            (1, 1), [(0, 0), (0, 0)],
            dimension_numbers=("NHWC", "HWIO", "NHWC"),
            preferred_element_type=jnp.float32)
    return out.astype(cd)


def _ref_basic_block(x, p, stride, equal_in_out, abr, cd):
    bn1 = _fold_bn(p["bn1_gamma"], p["bn1_beta"], p["bn1_mean"], p["bn1_var"])
    bn2 = _fold_bn(p["bn2_gamma"], p["bn2_beta"], p["bn2_mean"], p["bn2_var"])
    if equal_in_out:
        h = _ref_fused_conv3x3(x, p["w1"], stride, bn1, None, None, cd)
        return _ref_fused_conv3x3(h, p["w2"], 1, bn2, x, None, cd)
    xs = x if stride == 1 else x[:, ::stride, ::stride, :]
    if abr:
        h = _ref_fused_conv3x3(x, p["w1"], stride, bn1, None, None, cd)
        sc = dict(x=xs, w=p["ws"], bn=bn1)
    else:
        h = _ref_fused_conv3x3(x, p["w1"], stride, None, None, None, cd)
        sc = dict(x=xs, w=p["ws"], bn=None)
    return _ref_fused_conv3x3(h, p["w2"], 1, bn2, None, sc, cd)


# --------------------------- demo ----------------------------------------------

if __name__ == "__main__":
    key = jax.random.PRNGKey(0)
    kx, kp1, kp2 = jax.random.split(key, 3)

    # WRN-style demo: NetworkBlock(2 layers, 4->8, stride 2, abr=True) followed by
    # NetworkBlock(1 layer, 8->16, stride 2, abr=False), exercising all three
    # BasicBlock branches (identity residual, activated shortcut, raw shortcut),
    # both stride paths and the Cout-tiled packed matmul.
    x_nchw = jax.random.normal(kx, (2, 4, 16, 16), jnp.float32)
    net1 = NetworkBlockPallas(kp1, nb_layers=2, in_planes=4, out_planes=8,
                              stride=2, dropRate=0.0, activate_before_residual=True)
    net2 = NetworkBlockPallas(kp2, nb_layers=1, in_planes=8, out_planes=16,
                              stride=2, dropRate=0.0, activate_before_residual=False)

    y1 = net1(x_nchw)
    y2 = jax.block_until_ready(net2(y1))
    assert y1.shape == (2, 8, 8, 8), y1.shape
    assert y2.shape == (2, 16, 4, 4), y2.shape

    # Cross-check against a pure-JAX reference using the same bf16/f32 mixed precision.
    cd = jnp.bfloat16
    xr = jnp.transpose(x_nchw, (0, 2, 3, 1)).astype(cd)
    for blk in net1.blocks:
        xr = _ref_basic_block(xr, blk["params"], blk["stride"],
                              blk["equal_in_out"], blk["abr"], cd)
    y1_ref = jnp.transpose(xr.astype(jnp.float32), (0, 3, 1, 2))
    for blk in net2.blocks:
        xr = _ref_basic_block(xr, blk["params"], blk["stride"],
                              blk["equal_in_out"], blk["abr"], cd)
    y2_ref = jnp.transpose(xr.astype(jnp.float32), (0, 3, 1, 2))

    err1 = float(jnp.max(jnp.abs(y1 - y1_ref)))
    err2 = float(jnp.max(jnp.abs(y2 - y2_ref)))
    assert jnp.allclose(y1, y1_ref, rtol=2e-2, atol=2e-2), f"block1 max abs err {err1}"
    assert jnp.allclose(y2, y2_ref, rtol=2e-2, atol=2e-2), f"block2 max abs err {err2}"

    print("KERNEL_OK")
</pallas_src>

<mosaic_0001>
module attributes {stable_mosaic.version = 11 : i64} {
  func.func @_fused_conv_kernel(%arg0: i32, %arg1: i32, %arg2: memref<4x9x9x4xbf16, #tpu.memory_space<vmem>>, %arg3: memref<1x1x4xf32, #tpu.memory_space<vmem>>, %arg4: memref<1x1x4xf32, #tpu.memory_space<vmem>>, %arg5: memref<4x9x9x1xf32, #tpu.memory_space<vmem>>, %arg6: memref<36x8xbf16, #tpu.memory_space<vmem>>, %arg7: memref<1x8x8x8xbf16, #tpu.memory_space<vmem>>, %arg8: memref<64x36xbf16, #tpu.memory_space<vmem>>) attributes {dimension_semantics = [#tpu.dimension_semantics<parallel>, #tpu.dimension_semantics<arbitrary>], iteration_bounds = array<i64: 2, 1>, scalar_prefetch = 0 : i64, scratch_operands = 1 : i64, tpu.core_type = #tpu.core_type<tc>, window_params = [{transform_indices = @transform_0, window_bounds = array<i64: 4, 9, 9, 4>}, {pipeline_mode = #tpu.pipeline_mode<synchronous>, transform_indices = @transform_1, window_bounds = array<i64: 1, 1, 4>}, {pipeline_mode = #tpu.pipeline_mode<synchronous>, transform_indices = @transform_2, window_bounds = array<i64: 1, 1, 4>}, {pipeline_mode = #tpu.pipeline_mode<synchronous>, transform_indices = @transform_3, window_bounds = array<i64: 4, 9, 9, 1>}, {transform_indices = @transform_4, window_bounds = array<i64: 36, 8>}, {transform_indices = @transform_5, window_bounds = array<i64: 1, 8, 8, 8>}]} {
    %c0_i32 = arith.constant 0 : i32
    %0 = arith.cmpi eq, %arg1, %c0_i32 : i32
    %1 = arith.extui %0 : i1 to i32
    %c0_i32_0 = arith.constant 0 : i32
    %2 = arith.cmpi ne, %1, %c0_i32_0 : i32
    scf.if %2 {
      %c0_8 = arith.constant 0 : index
      %c0_9 = arith.constant 0 : index
      %c0_10 = arith.constant 0 : index
      %c0_11 = arith.constant 0 : index
      %11 = vector.load %arg2[%c0_8, %c0_9, %c0_10, %c0_11] : memref<4x9x9x4xbf16, #tpu.memory_space<vmem>>, vector<1x9x9x4xbf16>
      %12 = vector.shape_cast %11 : vector<1x9x9x4xbf16> to vector<9x9x4xbf16>
      %13 = arith.extf %12 : vector<9x9x4xbf16> to vector<9x9x4xf32>
      %c0_12 = arith.constant 0 : index
      %c0_13 = arith.constant 0 : index
      %c0_14 = arith.constant 0 : index
      %14 = vector.load %arg3[%c0_12, %c0_13, %c0_14] : memref<1x1x4xf32, #tpu.memory_space<vmem>>, vector<1x1x4xf32>
      %15 = vector.broadcast %14 : vector<1x1x4xf32> to vector<9x9x4xf32>
      %16 = arith.mulf %13, %15 : vector<9x9x4xf32>
      %c0_15 = arith.constant 0 : index
      %c0_16 = arith.constant 0 : index
      %c0_17 = arith.constant 0 : index
      %17 = vector.load %arg4[%c0_15, %c0_16, %c0_17] : memref<1x1x4xf32, #tpu.memory_space<vmem>>, vector<1x1x4xf32>
      %18 = vector.broadcast %17 : vector<1x1x4xf32> to vector<9x9x4xf32>
      %19 = arith.addf %16, %18 : vector<9x9x4xf32>
      %cst_18 = arith.constant 0.000000e+00 : f32
      %20 = vector.broadcast %cst_18 : f32 to vector<9x9x4xf32>
      %21 = arith.cmpf ogt, %19, %20 : vector<9x9x4xf32>
      %cst_19 = arith.constant 1.000000e-01 : f32
      %22 = vector.broadcast %cst_19 : f32 to vector<9x9x4xf32>
      %23 = arith.mulf %22, %19 : vector<9x9x4xf32>
      %24 = arith.select %21, %19, %23 : vector<9x9x4xi1>, vector<9x9x4xf32>
      %c0_20 = arith.constant 0 : index
      %c0_21 = arith.constant 0 : index
      %c0_22 = arith.constant 0 : index
      %c0_23 = arith.constant 0 : index
      %25 = vector.load %arg5[%c0_20, %c0_21, %c0_22, %c0_23] : memref<4x9x9x1xf32, #tpu.memory_space<vmem>>, vector<1x9x9x1xf32>
      %26 = vector.shape_cast %25 : vector<1x9x9x1xf32> to vector<9x9x1xf32>
      %27 = vector.broadcast %26 : vector<9x9x1xf32> to vector<9x9x4xf32>
      %28 = arith.mulf %24, %27 : vector<9x9x4xf32>
      %29 = arith.truncf %28 : vector<9x9x4xf32> to vector<9x9x4xbf16>
      %c1 = arith.constant 1 : index
      %c0_24 = arith.constant 0 : index
      %c0_25 = arith.constant 0 : index
      %c0_26 = arith.constant 0 : index
      %30 = vector.load %arg2[%c1, %c0_24, %c0_25, %c0_26] : memref<4x9x9x4xbf16, #tpu.memory_space<vmem>>, vector<1x9x9x4xbf16>
      %31 = vector.shape_cast %30 : vector<1x9x9x4xbf16> to vector<9x9x4xbf16>
      %32 = arith.extf %31 : vector<9x9x4xbf16> to vector<9x9x4xf32>
      %c0_27 = arith.constant 0 : index
      %c0_28 = arith.constant 0 : index
      %c0_29 = arith.constant 0 : index
      %33 = vector.load %arg3[%c0_27, %c0_28, %c0_29] : memref<1x1x4xf32, #tpu.memory_space<vmem>>, vector<1x1x4xf32>
      %34 = vector.broadcast %33 : vector<1x1x4xf32> to vector<9x9x4xf32>
      %35 = arith.mulf %32, %34 : vector<9x9x4xf32>
      %c0_30 = arith.constant 0 : index
      %c0_31 = arith.constant 0 : index
      %c0_32 = arith.constant 0 : index
      %36 = vector.load %arg4[%c0_30, %c0_31, %c0_32] : memref<1x1x4xf32, #tpu.memory_space<vmem>>, vector<1x1x4xf32>
      %37 = vector.broadcast %36 : vector<1x1x4xf32> to vector<9x9x4xf32>
      %38 = arith.addf %35, %37 : vector<9x9x4xf32>
      %cst_33 = arith.constant 0.000000e+00 : f32
      %39 = vector.broadcast %cst_33 : f32 to vector<9x9x4xf32>
      %40 = arith.cmpf ogt, %38, %39 : vector<9x9x4xf32>
      %cst_34 = arith.constant 1.000000e-01 : f32
      %41 = vector.broadcast %cst_34 : f32 to vector<9x9x4xf32>
      %42 = arith.mulf %41, %38 : vector<9x9x4xf32>
      %43 = arith.select %40, %38, %42 : vector<9x9x4xi1>, vector<9x9x4xf32>
      %c1_35 = arith.constant 1 : index
      %c0_36 = arith.constant 0 : index
      %c0_37 = arith.constant 0 : index
      %c0_38 = arith.constant 0 : index
      %44 = vector.load %arg5[%c1_35, %c0_36, %c0_37, %c0_38] : memref<4x9x9x1xf32, #tpu.memory_space<vmem>>, vector<1x9x9x1xf32>
      %45 = vector.shape_cast %44 : vector<1x9x9x1xf32> to vector<9x9x1xf32>
      %46 = vector.broadcast %45 : vector<9x9x1xf32> to vector<9x9x4xf32>
      %47 = arith.mulf %43, %46 : vector<9x9x4xf32>
      %48 = arith.truncf %47 : vector<9x9x4xf32> to vector<9x9x4xbf16>
      %c2 = arith.constant 2 : index
      %c0_39 = arith.constant 0 : index
      %c0_40 = arith.constant 0 : index
      %c0_41 = arith.constant 0 : index
      %49 = vector.load %arg2[%c2, %c0_39, %c0_40, %c0_41] : memref<4x9x9x4xbf16, #tpu.memory_space<vmem>>, vector<1x9x9x4xbf16>
      %50 = vector.shape_cast %49 : vector<1x9x9x4xbf16> to vector<9x9x4xbf16>
      %51 = arith.extf %50 : vector<9x9x4xbf16> to vector<9x9x4xf32>
      %c0_42 = arith.constant 0 : index
      %c0_43 = arith.constant 0 : index
      %c0_44 = arith.constant 0 : index
      %52 = vector.load %arg3[%c0_42, %c0_43, %c0_44] : memref<1x1x4xf32, #tpu.memory_space<vmem>>, vector<1x1x4xf32>
      %53 = vector.broadcast %52 : vector<1x1x4xf32> to vector<9x9x4xf32>
      %54 = arith.mulf %51, %53 : vector<9x9x4xf32>
      %c0_45 = arith.constant 0 : index
      %c0_46 = arith.constant 0 : index
      %c0_47 = arith.constant 0 : index
      %55 = vector.load %arg4[%c0_45, %c0_46, %c0_47] : memref<1x1x4xf32, #tpu.memory_space<vmem>>, vector<1x1x4xf32>
      %56 = vector.broadcast %55 : vector<1x1x4xf32> to vector<9x9x4xf32>
      %57 = arith.addf %54, %56 : vector<9x9x4xf32>
      %cst_48 = arith.constant 0.000000e+00 : f32
      %58 = vector.broadcast %cst_48 : f32 to vector<9x9x4xf32>
      %59 = arith.cmpf ogt, %57, %58 : vector<9x9x4xf32>
      %cst_49 = arith.constant 1.000000e-01 : f32
      %60 = vector.broadcast %cst_49 : f32 to vector<9x9x4xf32>
      %61 = arith.mulf %60, %57 : vector<9x9x4xf32>
      %62 = arith.select %59, %57, %61 : vector<9x9x4xi1>, vector<9x9x4xf32>
      %c2_50 = arith.constant 2 : index
      %c0_51 = arith.constant 0 : index
      %c0_52 = arith.constant 0 : index
      %c0_53 = arith.constant 0 : index
      %63 = vector.load %arg5[%c2_50, %c0_51, %c0_52, %c0_53] : memref<4x9x9x1xf32, #tpu.memory_space<vmem>>, vector<1x9x9x1xf32>
      %64 = vector.shape_cast %63 : vector<1x9x9x1xf32> to vector<9x9x1xf32>
      %65 = vector.broadcast %64 : vector<9x9x1xf32> to vector<9x9x4xf32>
      %66 = arith.mulf %62, %65 : vector<9x9x4xf32>
      %67 = arith.truncf %66 : vector<9x9x4xf32> to vector<9x9x4xbf16>
      %c3 = arith.constant 3 : index
      %c0_54 = arith.constant 0 : index
      %c0_55 = arith.constant 0 : index
      %c0_56 = arith.constant 0 : index
      %68 = vector.load %arg2[%c3, %c0_54, %c0_55, %c0_56] : memref<4x9x9x4xbf16, #tpu.memory_space<vmem>>, vector<1x9x9x4xbf16>
      %69 = vector.shape_cast %68 : vector<1x9x9x4xbf16> to vector<9x9x4xbf16>
      %70 = arith.extf %69 : vector<9x9x4xbf16> to vector<9x9x4xf32>
      %c0_57 = arith.constant 0 : index
      %c0_58 = arith.constant 0 : index
      %c0_59 = arith.constant 0 : index
      %71 = vector.load %arg3[%c0_57, %c0_58, %c0_59] : memref<1x1x4xf32, #tpu.memory_space<vmem>>, vector<1x1x4xf32>
      %72 = vector.broadcast %71 : vector<1x1x4xf32> to vector<9x9x4xf32>
      %73 = arith.mulf %70, %72 : vector<9x9x4xf32>
      %c0_60 = arith.constant 0 : index
      %c0_61 = arith.constant 0 : index
      %c0_62 = arith.constant 0 : index
      %74 = vector.load %arg4[%c0_60, %c0_61, %c0_62] : memref<1x1x4xf32, #tpu.memory_space<vmem>>, vector<1x1x4xf32>
      %75 = vector.broadcast %74 : vector<1x1x4xf32> to vector<9x9x4xf32>
      %76 = arith.addf %73, %75 : vector<9x9x4xf32>
      %cst_63 = arith.constant 0.000000e+00 : f32
      %77 = vector.broadcast %cst_63 : f32 to vector<9x9x4xf32>
      %78 = arith.cmpf ogt, %76, %77 : vector<9x9x4xf32>
      %cst_64 = arith.constant 1.000000e-01 : f32
      %79 = vector.broadcast %cst_64 : f32 to vector<9x9x4xf32>
      %80 = arith.mulf %79, %76 : vector<9x9x4xf32>
      %81 = arith.select %78, %76, %80 : vector<9x9x4xi1>, vector<9x9x4xf32>
      %c3_65 = arith.constant 3 : index
      %c0_66 = arith.constant 0 : index
      %c0_67 = arith.constant 0 : index
      %c0_68 = arith.constant 0 : index
      %82 = vector.load %arg5[%c3_65, %c0_66, %c0_67, %c0_68] : memref<4x9x9x1xf32, #tpu.memory_space<vmem>>, vector<1x9x9x1xf32>
      %83 = vector.shape_cast %82 : vector<1x9x9x1xf32> to vector<9x9x1xf32>
      %84 = vector.broadcast %83 : vector<9x9x1xf32> to vector<9x9x4xf32>
      %85 = arith.mulf %81, %84 : vector<9x9x4xf32>
      %86 = arith.truncf %85 : vector<9x9x4xf32> to vector<9x9x4xbf16>
      %87 = vector.extract_strided_slice %29 {offsets = [0, 0, 0], sizes = [8, 8, 4], strides = [1, 1, 1]} : vector<9x9x4xbf16> to vector<8x8x4xbf16>
      %88 = vector.shape_cast %87 : vector<8x8x4xbf16> to vector<64x4xbf16>
      %89 = vector.extract_strided_slice %48 {offsets = [0, 0, 0], sizes = [8, 8, 4], strides = [1, 1, 1]} : vector<9x9x4xbf16> to vector<8x8x4xbf16>
      %90 = vector.shape_cast %89 : vector<8x8x4xbf16> to vector<64x4xbf16>
      %91 = vector.extract_strided_slice %29 {offsets = [0, 1, 0], sizes = [8, 8, 4], strides = [1, 1, 1]} : vector<9x9x4xbf16> to vector<8x8x4xbf16>
      %92 = vector.shape_cast %91 : vector<8x8x4xbf16> to vector<64x4xbf16>
      %93 = vector.extract_strided_slice %67 {offsets = [0, 0, 0], sizes = [8, 8, 4], strides = [1, 1, 1]} : vector<9x9x4xbf16> to vector<8x8x4xbf16>
      %94 = vector.shape_cast %93 : vector<8x8x4xbf16> to vector<64x4xbf16>
      %95 = vector.extract_strided_slice %86 {offsets = [0, 0, 0], sizes = [8, 8, 4], strides = [1, 1, 1]} : vector<9x9x4xbf16> to vector<8x8x4xbf16>
      %96 = vector.shape_cast %95 : vector<8x8x4xbf16> to vector<64x4xbf16>
      %97 = vector.extract_strided_slice %67 {offsets = [0, 1, 0], sizes = [8, 8, 4], strides = [1, 1, 1]} : vector<9x9x4xbf16> to vector<8x8x4xbf16>
      %98 = vector.shape_cast %97 : vector<8x8x4xbf16> to vector<64x4xbf16>
      %99 = vector.extract_strided_slice %29 {offsets = [1, 0, 0], sizes = [8, 8, 4], strides = [1, 1, 1]} : vector<9x9x4xbf16> to vector<8x8x4xbf16>
      %100 = vector.shape_cast %99 : vector<8x8x4xbf16> to vector<64x4xbf16>
      %101 = vector.extract_strided_slice %48 {offsets = [1, 0, 0], sizes = [8, 8, 4], strides = [1, 1, 1]} : vector<9x9x4xbf16> to vector<8x8x4xbf16>
      %102 = vector.shape_cast %101 : vector<8x8x4xbf16> to vector<64x4xbf16>
      %103 = vector.extract_strided_slice %29 {offsets = [1, 1, 0], sizes = [8, 8, 4], strides = [1, 1, 1]} : vector<9x9x4xbf16> to vector<8x8x4xbf16>
      %104 = vector.shape_cast %103 : vector<8x8x4xbf16> to vector<64x4xbf16>
      %105 = tpu.concatenate %88, %90, %92, %94, %96, %98, %100, %102, %104 in 1 : vector<64x4xbf16>, vector<64x4xbf16>, vector<64x4xbf16>, vector<64x4xbf16>, vector<64x4xbf16>, vector<64x4xbf16>, vector<64x4xbf16>, vector<64x4xbf16>, vector<64x4xbf16> -> vector<64x36xbf16>
      %c0_69 = arith.constant 0 : index
      %c0_70 = arith.constant 0 : index
      %106 = vector.load %arg8[%c0_69, %c0_70] : memref<64x36xbf16, #tpu.memory_space<vmem>>, vector<64x36xbf16>
      tpu.vector_store %arg8[%c0_69, %c0_70], %105 {strides = array<i32>} : memref<64x36xbf16, #tpu.memory_space<vmem>>, vector<64x36xbf16>,
    } else {
    }
    %c0 = arith.constant 0 : index
    %c0_1 = arith.constant 0 : index
    %3 = vector.load %arg8[%c0, %c0_1] : memref<64x36xbf16, #tpu.memory_space<vmem>>, vector<64x36xbf16>
    %c0_2 = arith.constant 0 : index
    %c0_3 = arith.constant 0 : index
    %4 = vector.load %arg6[%c0_2, %c0_3] : memref<36x8xbf16, #tpu.memory_space<vmem>>, vector<36x8xbf16>
    %cst = arith.constant dense<0.000000e+00> : vector<64x8xf32>
    %5 = tpu.matmul %3, %4, %cst {dimension_numbers = #tpu.dot_dimension_numbers<[1], [0], [0], [1], [0, 0, 1, 1], [], []>} : vector<64x36xbf16>, vector<36x8xbf16>, vector<64x8xf32> -> vector<64x8xf32>
    %6 = vector.shape_cast %5 : vector<64x8xf32> to vector<8x8x8xf32>
    %7 = arith.truncf %6 : vector<8x8x8xf32> to vector<8x8x8xbf16>
    %c0_4 = arith.constant 0 : index
    %c0_5 = arith.constant 0 : index
    %c0_6 = arith.constant 0 : index
    %c0_7 = arith.constant 0 : index
    %8 = vector.load %arg7[%c0_4, %c0_5, %c0_6, %c0_7] : memref<1x8x8x8xbf16, #tpu.memory_space<vmem>>, vector<1x8x8x8xbf16>
    %9 = vector.shape_cast %8 : vector<1x8x8x8xbf16> to vector<8x8x8xbf16>
    %10 = vector.shape_cast %7 : vector<8x8x8xbf16> to vector<1x8x8x8xbf16>
    tpu.vector_store %arg7[%c0_4, %c0_5, %c0_6, %c0_7], %10 {strides = array<i32>} : memref<1x8x8x8xbf16, #tpu.memory_space<vmem>>, vector<1x8x8x8xbf16>,
    return
  }
  func.func @transform_0(%arg0: i32, %arg1: i32) -> (i32, i32, i32, i32) {
    %c0_i32 = arith.constant 0 : i32
    %c0_i32_0 = arith.constant 0 : i32
    %c0_i32_1 = arith.constant 0 : i32
    %c0_i32_2 = arith.constant 0 : i32
    return %arg0, %c0_i32, %c0_i32_0, %c0_i32_1 : i32, i32, i32, i32
  }
  func.func @transform_1(%arg0: i32, %arg1: i32) -> (i32, i32, i32) {
    %c0_i32 = arith.constant 0 : i32
    %c0_i32_0 = arith.constant 0 : i32
    %c0_i32_1 = arith.constant 0 : i32
    %c0_i32_2 = arith.constant 0 : i32
    return %c0_i32, %c0_i32_0, %c0_i32_1 : i32, i32, i32
  }
  func.func @transform_2(%arg0: i32, %arg1: i32) -> (i32, i32, i32) {
    %c0_i32 = arith.constant 0 : i32
    %c0_i32_0 = arith.constant 0 : i32
    %c0_i32_1 = arith.constant 0 : i32
    %c0_i32_2 = arith.constant 0 : i32
    return %c0_i32, %c0_i32_0, %c0_i32_1 : i32, i32, i32
  }
  func.func @transform_3(%arg0: i32, %arg1: i32) -> (i32, i32, i32, i32) {
    %c0_i32 = arith.constant 0 : i32
    %c0_i32_0 = arith.constant 0 : i32
    %c0_i32_1 = arith.constant 0 : i32
    %c0_i32_2 = arith.constant 0 : i32
    %c0_i32_3 = arith.constant 0 : i32
    return %c0_i32, %c0_i32_0, %c0_i32_1, %c0_i32_2 : i32, i32, i32, i32
  }
  func.func @transform_4(%arg0: i32, %arg1: i32) -> (i32, i32) {
    %c0_i32 = arith.constant 0 : i32
    %c0_i32_0 = arith.constant 0 : i32
    return %c0_i32, %arg1 : i32, i32
  }
  func.func @transform_5(%arg0: i32, %arg1: i32) -> (i32, i32, i32, i32) {
    %c0_i32 = arith.constant 0 : i32
    %c0_i32_0 = arith.constant 0 : i32
    %c0_i32_1 = arith.constant 0 : i32
    return %arg0, %c0_i32, %c0_i32_0, %arg1 : i32, i32, i32, i32
  }
}

</mosaic_0001>

<bundles_post_ra>
// kernel: tpu_custom_call.1
= control target key start
LH: loop header
LB: loop body
LE: loop exit
PB: predicated region body
PF: predicated region fallthrough
CT: control target
= control target key end

     0   :  { %10 = vsyncpa [#allocation4], 0  ;;  %s3503_s0 = inlined_call_operand.vmem [shape: bf16[8,9,9,4], index: 0, kind: input, shape index: {}]   ;;  %s3504_s1 = inlined_call_operand.vmem [shape: f32[1,1,4], index: 1, kind: input, shape index: {}]   ;;  %s3505_s2 = inlined_call_operand.vmem [shape: f32[1,1,4], index: 2, kind: input, shape index: {}]   ;;  %s3506_s3 = inlined_call_operand.vmem [shape: f32[4,9,9,1], index: 3, kind: input, shape index: {}]   ;;  %s3507_s4 = inlined_call_operand.vmem [shape: bf16[36,8], index: 4, kind: input, shape index: {}]   ;;  %s3508_s5 = inlined_call_operand.hbm [shape: bf16[2,8,8,8], index: 5, kind: output, shape index: {}]  }
   0x1   :  { %12 = vsyncpa [#allocation4 + $0x1], 0  ;;  %s2532_s18 = smov 0   ;;  %s2534_s19 = smov 0  }
   0x2   :  { %s2536_s20 = smov 0   ;;  %s2538_s21 = smov 0  }
   0x3   :  { %s2540_s22 = smov 0   ;;  %s2542_s23 = smov 0  }
   0x4 LB: > { %s2057_s24 = sadd.s32 4294967295, %s2489_s23   ;;  %s2058_s25 = sadd.s32 4294967294, %s2489_s23   ;;  %s2489_s23 = sphi %s2542_s23, %s18_s23   ;;  %s2485_s22 = sphi %s2540_s22, %s3587_s22   ;;  %s2481_s21 = sphi %s2538_s21, %s3586_s21   ;;  %s2477_s20 = sphi %s2536_s20, %s3585_s20   ;;  %s2473_s19 = sphi %s2534_s19, %s3584_s19   ;;  %s2469_s18 = sphi %s2532_s18, %s3583_s18  }
   0x5   : > { %s30_s26 = sadd.s32 1, %s2485_s22  ;;  %s154_s27 = sadd.s32 1, %s2477_s20 }
   0x6   : > { %p32_p0 = scmp.ge.s32.totalorder %s30_s26, 2  ;;  %p164_p1 = scmp.ne.s32.totalorder %s2477_s20, %s2473_s19 }
   0x7   : > { %p165_p2 = scmp.eq.s32.totalorder %s2057_s24, 1  ;;  %p170_p3 = scmp.ne.s32.totalorder %s2473_s19, %s2469_s18 }
   0x8   : > { %s3589_s26 = smov (%p32_p0, %s30_s26), 0  ;;  %p171_p5 = scmp.eq.s32.totalorder %s2058_s25, 1 }
   0x9   : > { %p2572_p4 = por %p165_p2, %p164_p1  ;;  %s149_s29 = ssub.s32 %s2485_s22, %s3589_s26 }
   0xa   : > { %p2062_p6 = scmp.ge.s32.totalorder %s2489_s23, 1  ;;  %p152_p7 = scmp.eq.s32.totalorder %s149_s29, 0 }
   0xb   : > { %p2579_p8 = por %p171_p5, %p170_p3  ;;  %p215_p9 = scmp.lt.s32.totalorder %s2489_s23, 3 }
   0xc   : > { %s2585_s6 = scalar_select %p152_p7, %s2477_s20, %s154_s27  }
   0xd   : > { %p216_p10 = pnand %p2062_p6, %p215_p9 }
   0xf   : > { %219 = sbr.rel (%p216_p10) target bundleno = 648 (0x288), region = 40 }
  0x16   : > { %v412_v0 = vld [vmem:[%s3506_s3 + $0x40] sm:$0xff]  ;;  %v2491_v2 = vmov 0   ;;  %v414_v3 = vld [vmem:[%s3506_s3 + $0x50] sm:$0xff]  ;;  %v407_v13 = vld [vmem:[%s3506_s3 + $0x18] sm:$0x1]  ;;  %s2064_s25 = sshll.u32 %s2481_s21, 2 }
  0x17   : > { %v404_v1 = vld [vmem:[%s3506_s3] sm:$0xff]  ;;  %2405 = vset.pattern.permute.xlu1 %v2491_v2  ;;  %2404 = vset.pattern.permute.xlu0 %v2491_v2  ;;  %v406_v4 = vld [vmem:[%s3506_s3 + $0x10] sm:$0xff]  ;;  %v405_v14 = vld [vmem:[%s3506_s3 + $0x8] sm:$0x1]  ;;  %p249_p11 = scmp.lt.s32.totalorder %s2064_s25, 7  ;;  %s2492_s14 = smov 4  }
  0x18   : > { %464 = vperm.xlu1 %2405, %v412_v0   ;;  %424 = vperm.xlu0 %2404, %v404_v1   ;;  %v410_v5 = vld [vmem:[%s3506_s3 + $0x30] sm:$0xff]  ;;  %v408_v6 = vld [vmem:[%s3506_s3 + $0x20] sm:$0xff]  ;;  %v415_v15 = vld [vmem:[%s3506_s3 + $0x58] sm:$0x1]  ;;  %s2493_s27 = smov 12   ;;  %s2494_s7 = smov 16  }
  0x19   : > { %v418_v7 = vld [vmem:[%s3506_s3 + $0x70] sm:$0xff]  ;;  %v416_v8 = vld [vmem:[%s3506_s3 + $0x60] sm:$0xff]  ;;  %v413_v16 = vld [vmem:[%s3506_s3 + $0x48] sm:$0x1]  ;;  %s3591_s25 = smov (!%p249_p11, %s2064_s25), 7  ;;  %s2495_s8 = smov 24  }
  0x1a   : > { %v2122_v9 = vld [vmem:[%s3506_s3 + $0x130] sm:$0xff]  ;;  %v2120_v10 = vld [vmem:[%s3506_s3 + $0x120] sm:$0xff]  ;;  %v411_v21 = vld [vmem:[%s3506_s3 + $0x38] sm:$0x1]  ;;  %s2338_s13 = smul.u32 72, %s3591_s25  ;;  %s2497_s25 = smov 20  }
  0x1b   : > { %v2130_v11 = vld [vmem:[%s3506_s3 + $0x170] sm:$0xff]  ;;  %v2128_v12 = vld [vmem:[%s3506_s3 + $0x160] sm:$0xff]  ;;  %v409_v22 = vld [vmem:[%s3506_s3 + $0x28] sm:$0x1]  ;;  %s2498_s11 = smov 28   ;;  %s2499_s17 = smov 32  }
  0x1c   : > { %474 = vperm.xlu1 %2405, %v414_v3   ;;  %434 = vperm.xlu0 %2404, %v406_v4   ;;  %v2126_v17 = vld [vmem:[%s3506_s3 + $0x150] sm:$0xff]  ;;  %v2124_v18 = vld [vmem:[%s3506_s3 + $0x140] sm:$0xff]  ;;  %v419_v23 = vld [vmem:[%s3506_s3 + $0x78] sm:$0x1]  ;;  %s2717_s29 = scalar_lea.vmem %s3503_s0, %s2338_s13  ;;  %s245_s24 = sand.u32 1, %s2473_s19  }
  0x1d   : > { %v2134_v19 = vld [vmem:[%s3506_s3 + $0x190] sm:$0xff]  ;;  %v2132_v20 = vld [vmem:[%s3506_s3 + $0x180] sm:$0xff]  ;;  %v417_v24 = vld [vmem:[%s3506_s3 + $0x68] sm:$0x1]  ;;  %s2500_s12 = smov [#allocation3]  }
  0x1e   : > { %v2121_v25 = vld [vmem:[%s3506_s3 + $0x128] sm:$0x1]  ;;  %v420_v26 = vld [vmem:[%s3506_s3 + $0x80] sm:$0xff]  ;;  %v2123_v28 = vld [vmem:[%s3506_s3 + $0x138] sm:$0x1]  ;;  %s2415_s13 = sshll.u32 %s2500_s12, 4  ;;  %s2416_s13 = int_to_ptr.vmem [resolvable:$false] %s2415_s13 }
  0x1f   : > { %v2129_v27 = vld [vmem:[%s3506_s3 + $0x168] sm:$0x1]  ;;  %v2131_v30 = vld [vmem:[%s3506_s3 + $0x178] sm:$0x1]  ;;  %v2086_v33 = vld [vmem:[%s3506_s3 + $0x90] sm:$0xff]  ;;  %s2417_s15 = scalar_lea.vmem %s2416_s13, 1024 }
  0x20   : > { %454 = vperm.xlu1 %2405, %v410_v5   ;;  %444 = vperm.xlu0 %2404, %v408_v6   ;;  %v2125_v29 = vld [vmem:[%s3506_s3 + $0x148] sm:$0x1]  ;;  %v2127_v32 = vld [vmem:[%s3506_s3 + $0x158] sm:$0x1]  ;;  %v2094_v35 = vld [vmem:[%s3506_s3 + $0xd0] sm:$0xff] }
  0x21   : > { %v2133_v31 = vld [vmem:[%s3506_s3 + $0x188] sm:$0x1]  ;;  %v2135_v34 = vld [vmem:[%s3506_s3 + $0x198] sm:$0x1]  ;;  %v2088_v36 = vld [vmem:[%s3506_s3 + $0xa0] sm:$0xff] }
  0x22   : > { %v421_v37 = vld [vmem:[%s3506_s3 + $0x88] sm:$0x1]  ;;  %v2096_v38 = vld [vmem:[%s3506_s3 + $0xe0] sm:$0xff]  ;;  %v2090_v40 = vld [vmem:[%s3506_s3 + $0xb0] sm:$0xff] }
  0x23   : > { %v2092_v39 = vld [vmem:[%s3506_s3 + $0xc0] sm:$0xff]  ;;  %v2098_v42 = vld [vmem:[%s3506_s3 + $0xf0] sm:$0xff] }
  0x24   : > { %494 = vperm.xlu1 %2405, %v418_v7   ;;  %484 = vperm.xlu0 %2404, %v416_v8   ;;  %v2100_v41 = vld [vmem:[%s3506_s3 + $0x100] sm:$0xff]  ;;  %v2152_v44 = vld [vmem:[%s3506_s3 + $0x1b0] sm:$0xff] }
  0x25   : > { %v2154_v43 = vld [vmem:[%s3506_s3 + $0x1c0] sm:$0xff]  ;;  %v2160_v47 = vld [vmem:[%s3506_s3 + $0x1f0] sm:$0xff] }
  0x26   : > { %v272_v45 = vld [vmem:[%s2717_s29 + $0x20] ss:$8 sps:$4 sm:$0xff]   ;;  %v270_v52 = vld [vmem:[%s2717_s29 + $0x10] ss:$8 sps:$4 sm:$0xff]  }
  0x27   : > { %v2162_v46 = vld [vmem:[%s3506_s3 + $0x200] sm:$0xff]  ;;  %v290_v48 = vunpack.c.l.bf16 %v272_v45  ;;  %v292_v51 = vunpack.c.h.bf16 %v272_v45  ;;  %v2156_v54 = vld [vmem:[%s3506_s3 + $0x1d0] sm:$0xff]  ;;  %v288_v59 = vunpack.c.h.bf16 %v270_v52  ;;  %v286_v61 = vunpack.c.l.bf16 %v270_v52 }
  0x28   : > { %944 = vperm.xlu1 %2405, %v2122_v9   ;;  %934 = vperm.xlu0 %2404, %v2120_v10   ;;  %v264_v49 = vld [vmem:[%s2717_s29] ss:$8 sps:$4 sm:$0xff]   ;;  %v278_v62 = vld [vmem:[%s2717_s29 + $0x30] ss:$8 sps:$4 sm:$0xff]   ;;  %v273_v45 = vld [vmem:[%s2717_s29 + $0x24] sm:$0x1] }
  0x29   : > { %v2736_v50 = vld [vmem:[%s3504_s1] ss:$0 sm:$0xff]  ;;  %v282_v55 = vunpack.c.l.bf16 %v264_v49  ;;  %v284_v56 = vunpack.c.h.bf16 %v264_v49  ;;  %v2164_v0 = vld [vmem:[%s3506_s3 + $0x210] sm:$0xff]  ;;  %v296_v6 = vunpack.c.h.bf16 %v278_v62  ;;  %v294_v9 = vunpack.c.l.bf16 %v278_v62 }
  0x2a   : > { %v2158_v53 = vld [vmem:[%s3506_s3 + $0x1e0] sm:$0xff]  ;;  %v315_v57 = vmul.f32 %v2736_v50, %v290_v48  ;;  %v317_v60 = vmul.f32 %v2736_v50, %v292_v51  ;;  %v2106_v4 = vld [vmem:[%s2717_s29 + $0x90] ss:$8 sps:$4 sm:$0xff]   ;;  %v313_v5 = vmul.f32 %v2736_v50, %v288_v59  ;;  %v311_v8 = vmul.f32 %v2736_v50, %v286_v61 }
  0x2b   : > { %v2749_v58 = vld [vmem:[%s3505_s2] ss:$0 sm:$0xff]  ;;  %v307_v1 = vmul.f32 %v2736_v50, %v282_v55  ;;  %v309_v2 = vmul.f32 %v2736_v50, %v284_v56  ;;  %v2102_v10 = vld [vmem:[%s3506_s3 + $0x110] sm:$0xff] }
  0x2c   : > { %984 = vperm.xlu1 %2405, %v2130_v11   ;;  %974 = vperm.xlu0 %2404, %v2128_v12   ;;  %v2166_v63 = vld [vmem:[%s3506_s3 + $0x220] sm:$0xff]  ;;  %v340_v3 = vadd.f32 %v2749_v58, %v315_v57  ;;  %v342_v7 = vadd.f32 %v2749_v58, %v317_v60  ;;  %v291_v57 = vunpack.c.l.bf16 %v273_v45 }
  0x2d   : > { %v332_v11 = vadd.f32 %v2749_v58, %v307_v1  ;;  %v334_v12 = vadd.f32 %v2749_v58, %v309_v2  ;;  %v2110_v51 = vld [vmem:[%s2717_s29 + $0xa0] ss:$8 sps:$4 sm:$0xff]  }
  0x2e   : > { %vm358_vm0 = vcmp.gt.f32.partialorder %v340_v3, 0.0  ;;  %vm360_vm1 = vcmp.gt.f32.partialorder %v342_v7, 0.0  ;;  %v2118_v59 = vld [vmem:[%s2717_s29 + $0xc0] ss:$8 sps:$4 sm:$0xff]   ;;  %v825_v62 = vunpack.c.h.bf16 %v2110_v51  ;;  %v823_v2 = vunpack.c.l.bf16 %v2110_v51 }
  0x2f   : > { %vm350_vm2 = vcmp.gt.f32.partialorder %v332_v11, 0.0  ;;  %vm352_vm3 = vcmp.gt.f32.partialorder %v334_v12, 0.0 }
  0x30   : > { %439 = vperm.xlu1 %2405, %v407_v13   ;;  %429 = vperm.xlu0 %2404, %v405_v14   ;;  %v821_v13 = vunpack.c.h.bf16 %v2106_v4  ;;  %v376_v14 = vmul.f32 0.1, %v340_v3 }
  0x34   : > { %479 = vperm.xlu1 %2405, %v415_v15   ;;  %469 = vperm.xlu0 %2404, %v413_v16   ;;  %v338_v15 = vadd.f32 %v2749_v58, %v313_v5  ;;  %v321_v16 = vmul.f32 %v2736_v50, %v296_v6  ;;  %v833_v5 = vunpack.c.h.bf16 %v2118_v59 }
  0x36   : > { %vm356_vm4 = vcmp.gt.f32.partialorder %v338_v15, 0.0 }
  0x38   : > { %964 = vperm.xlu1 %2405, %v2126_v17   ;;  %954 = vperm.xlu0 %2404, %v2124_v18   ;;  %v819_v17 = vunpack.c.l.bf16 %v2106_v4  ;;  %v2114_v18 = vld [vmem:[%s2717_s29 + $0xb0] ss:$8 sps:$4 sm:$0xff]  }
  0x3c   : > { %1004 = vperm.xlu1 %2405, %v2134_v19   ;;  %994 = vperm.xlu0 %2404, %v2132_v20   ;;  %v378_v19 = vmul.f32 0.1, %v342_v7  ;;  %v336_v20 = vadd.f32 %v2749_v58, %v311_v8  ;;  %v316_v8 = vmul.f32 %v2736_v50, %v291_v57 }
  0x3e   : > { %vm354_vm5 = vcmp.gt.f32.partialorder %v336_v20, 0.0 }
  0x40   : > { %459 = vperm.xlu1 %2405, %v411_v21   ;;  %449 = vperm.xlu0 %2404, %v409_v22   ;;  %v319_v21 = vmul.f32 %v2736_v50, %v294_v9  ;;  %v267_v22 = vld [vmem:[%s2717_s29 + $0xc] sm:$0x1]  ;;  %v831_v9 = vunpack.c.l.bf16 %v2118_v59 }
  0x44   : > { %499 = vperm.xlu1 %2405, %v419_v23   ;;  %489 = vperm.xlu0 %2404, %v417_v24   ;;  %v368_v23 = vmul.f32 0.1, %v332_v11  ;;  %v837_v24 = vmul.f32 %v2736_v50, %v821_v13 }
  0x48   : > { %939 = vperm.xlu1 %2405, %v2121_v25   ;;  %504 = vperm.xlu0 %2404, %v420_v26   ;;  %v265_v25 = vld [vmem:[%s2717_s29 + $0x4] sm:$0x1]  ;;  %v2780_v26 = vsel %vm358_vm0, %v340_v3, %v376_v14 }
  0x4c   : > { %979 = vperm.xlu1 %2405, %v2129_v27   ;;  %949 = vperm.xlu0 %2404, %v2123_v28   ;;  %v370_v27 = vmul.f32 0.1, %v334_v12  ;;  %v829_v28 = vunpack.c.h.bf16 %v2114_v18 }
  0x50   : > { %959 = vperm.xlu1 %2405, %v2125_v29   ;;  %989 = vperm.xlu0 %2404, %v2131_v30   ;;  %v827_v29 = vunpack.c.l.bf16 %v2114_v18  ;;  %v275_v30 = vld [vmem:[%s2717_s29 + $0x2c] sm:$0x1] }
  0x54   : > { %999 = vperm.xlu1 %2405, %v2133_v31   ;;  %969 = vperm.xlu0 %2404, %v2127_v32   ;;  %v374_v31 = vmul.f32 0.1, %v338_v15  ;;  %v346_v32 = vadd.f32 %v2749_v58, %v321_v16  ;;  %v839_v16 = vmul.f32 %v2736_v50, %v823_v2 }
  0x56   : > { %vm364_vm6 = vcmp.gt.f32.partialorder %v346_v32, 0.0 }
  0x58   : > { %687 = vperm.xlu1 %2405, %v2086_v33   ;;  %1009 = vperm.xlu0 %2404, %v2135_v34   ;;  %v835_v33 = vmul.f32 %v2736_v50, %v819_v17  ;;  %v285_v34 = vunpack.c.l.bf16 %v267_v22  ;;  %v269_v17 = vld [vmem:[%s2717_s29 + $0x14] sm:$0x1]  ;;  %v341_v22 = vadd.f32 %v2749_v58, %v316_v8 }
  0x5a   : > { %v851_v48 = vadd.f32 %v2749_v58, %v835_v33  ;;  %v310_v49 = vmul.f32 %v2736_v50, %v285_v34  ;;  %v855_v33 = vadd.f32 %v2749_v58, %v839_v16  ;;  %v377_v45 = vmul.f32 0.1, %v341_v22 }
  0x5b   : > { %vm359_vm15 = vcmp.gt.f32.partialorder %v341_v22, 0.0 }
  0x5c   : > { %727 = vperm.xlu1 %2405, %v2094_v35   ;;  %697 = vperm.xlu0 %2404, %v2088_v36   ;;  %v372_v35 = vmul.f32 0.1, %v336_v20  ;;  %v344_v36 = vadd.f32 %v2749_v58, %v319_v21  ;;  %v335_v1 = vadd.f32 %v2749_v58, %v310_v49  ;;  %vm867_vm9 = vcmp.gt.f32.partialorder %v851_v48, 0.0 }
  0x5d   : > { %v887_v57 = vmul.f32 0.1, %v855_v33 }
  0x5e   : > { %v2804_v52 = vsel %vm354_vm5, %v336_v20, %v372_v35  ;;  %vm362_vm7 = vcmp.gt.f32.partialorder %v344_v36, 0.0  ;;  %vm353_vm12 = vcmp.gt.f32.partialorder %v335_v1, 0.0  ;;  %v279_v20 = vld [vmem:[%s2717_s29 + $0x3c] sm:$0x1]  ;;  %v2845_v35 = vld [vmem:[%s2717_s29 + $0x40] ss:$8 sps:$4 sm:$0xff]  }
  0x5f   : > { %v297_v34 = vunpack.c.l.bf16 %v279_v20  ;;  %v298_v51 = vunpack.c.l.bf16 %v2845_v35 }
  0x60   : > { %509 = vperm.xlu1 %2405, %v421_v37   ;;  %737 = vperm.xlu0 %2404, %v2096_v38   ;;  %v283_v37 = vunpack.c.l.bf16 %v265_v25  ;;  %v2787_v38 = vsel %vm360_vm1, %v342_v7, %v378_v19  ;;  %v849_v19 = vmul.f32 %v2736_v50, %v833_v5  ;;  %v277_v25 = vld [vmem:[%s2717_s29 + $0x34] sm:$0x1]  ;;  %vm871_vm1 = vcmp.gt.f32.partialorder %v855_v33, 0.0 }
  0x61   : > { %v2875_v16 = vsel %vm871_vm1, %v855_v33, %v887_v57  ;;  %v2117_v57 = vld [vmem:[%s2717_s29 + $0xc4] sm:$0x1] }
  0x64   : > { %717 = vperm.xlu1 %2405, %v2092_v39   ;;  %707 = vperm.xlu0 %2404, %v2090_v40   ;;  %v853_v39 = vadd.f32 %v2749_v58, %v837_v24  ;;  %v293_v40 = vunpack.c.l.bf16 %v275_v30  ;;  %v287_v30 = vunpack.c.l.bf16 %v269_v17 }
  0x66   : > { %v885_v55 = vmul.f32 0.1, %v853_v39  ;;  %v318_v56 = vmul.f32 %v2736_v50, %v293_v40  ;;  %vm869_vm8 = vcmp.gt.f32.partialorder %v853_v39, 0.0  ;;  %v312_v49 = vmul.f32 %v2736_v50, %v287_v30 }
  0x68   : > { %757 = vperm.xlu1 %2405, %v2100_v41   ;;  %747 = vperm.xlu0 %2404, %v2098_v42   ;;  %v2791_v41 = vsel %vm350_vm2, %v332_v11, %v368_v23  ;;  %v2794_v42 = vsel %vm352_vm3, %v334_v12, %v370_v27  ;;  %v2817_v6 = vsel %vm869_vm8, %v853_v39, %v885_v55  ;;  %v271_v12 = vld [vmem:[%s2717_s29 + $0x1c] sm:$0x1]  ;;  %v2105_v27 = vld [vmem:[%s2717_s29 + $0x94] sm:$0x1]  ;;  %v295_v39 = vunpack.c.l.bf16 %v277_v25 }
  0x69   : > { %v343_v7 = vadd.f32 %v2749_v58, %v318_v56  ;;  %v841_v11 = vmul.f32 %v2736_v50, %v825_v62  ;;  %v847_v23 = vmul.f32 %v2736_v50, %v831_v9  ;;  %v289_v24 = vunpack.c.l.bf16 %v271_v12  ;;  %v2107_v56 = vld [vmem:[%s2717_s29 + $0x9c] sm:$0x1] }
  0x6a   : > { %v820_v40 = vunpack.c.l.bf16 %v2105_v27  ;;  %v320_v59 = vmul.f32 %v2736_v50, %v295_v39  ;;  %v2863_v62 = vsel %vm359_vm15, %v341_v22, %v377_v45  ;;  %v337_v5 = vadd.f32 %v2749_v58, %v312_v49 }
  0x6b   : > { %v379_v21 = vmul.f32 0.1, %v343_v7  ;;  %vm361_vm14 = vcmp.gt.f32.partialorder %v343_v7, 0.0  ;;  %v822_v8 = vunpack.c.l.bf16 %v2107_v56  ;;  %vm1310_vm15 = vsmask.f32 3328 }
  0x6c   : > { %1178 = vperm.xlu1 %2405, %v2154_v43   ;;  %1168 = vperm.xlu0 %2404, %v2152_v44   ;;  %v845_v43 = vmul.f32 %v2736_v50, %v829_v28  ;;  %v843_v44 = vmul.f32 %v2736_v50, %v827_v29  ;;  %v857_v29 = vadd.f32 %v2749_v58, %v841_v11  ;;  %vm355_vm5 = vcmp.gt.f32.partialorder %v337_v5, 0.0 }
  0x6d   : > { %v345_v17 = vadd.f32 %v2749_v58, %v320_v59  ;;  %v838_v25 = vmul.f32 %v2736_v50, %v822_v8 }
  0x6e   : > { %v861_v60 = vadd.f32 %v2749_v58, %v845_v43  ;;  %v859_v61 = vadd.f32 %v2749_v58, %v843_v44  ;;  %v2113_v43 = vld [vmem:[%s2717_s29 + $0xb4] sm:$0x1]  ;;  %v2852_v44 = vsel %vm361_vm14, %v343_v7, %v379_v21  ;;  %vm873_vm0 = vcmp.gt.f32.partialorder %v857_v29, 0.0 }
  0x6f   : > { %v828_v55 = vunpack.c.l.bf16 %v2113_v43  ;;  %v323_v7 = vmul.f32 %v2736_v50, %v298_v51 }
  0x70   : > { %1218 = vperm.xlu1 %2405, %v2162_v46   ;;  %1208 = vperm.xlu0 %2404, %v2160_v47   ;;  %v2799_v46 = vsel %vm356_vm4, %v338_v15, %v374_v31  ;;  %v382_v47 = vmul.f32 0.1, %v346_v32  ;;  %vm877_vm10 = vcmp.gt.f32.partialorder %v861_v60, 0.0  ;;  %vm875_vm11 = vcmp.gt.f32.partialorder %v859_v61, 0.0 }
  0x71   : > { %v891_v14 = vmul.f32 0.1, %v859_v61  ;;  %v371_v15 = vmul.f32 0.1, %v335_v1 }
  0x73   : > { %v2838_v31 = vsel %vm875_vm11, %v859_v61, %v891_v14  ;;  %v2115_v61 = vld [vmem:[%s2717_s29 + $0xbc] sm:$0x1]  ;;  %v844_v14 = vmul.f32 %v2736_v50, %v828_v55 }
  0x74   : > { %1198 = vperm.xlu1 %2405, %v2158_v53   ;;  %1188 = vperm.xlu0 %2404, %v2156_v54   ;;  %v380_v53 = vmul.f32 0.1, %v344_v36  ;;  %v308_v54 = vmul.f32 %v2736_v50, %v283_v37  ;;  %v865_v37 = vadd.f32 %v2749_v58, %v849_v19 }
  0x75   : > { %v860_v33 = vadd.f32 %v2749_v58, %v844_v14 }
  0x76   : > { %v2814_v3 = vsel %vm362_vm7, %v344_v36, %v380_v53  ;;  %v333_v4 = vadd.f32 %v2749_v58, %v308_v54  ;;  %v889_v53 = vmul.f32 0.1, %v857_v29  ;;  %v322_v54 = vmul.f32 %v2736_v50, %v297_v34 }
  0x77   : > { %vm881_vm2 = vcmp.gt.f32.partialorder %v865_v37, 0.0  ;;  %vm363_vm7 = vcmp.gt.f32.partialorder %v345_v17, 0.0  ;;  %v892_v56 = vmul.f32 0.1, %v860_v33 }
  0x78   : > { %1238 = vperm.xlu1 %2405, %v2166_v63   ;;  %1228 = vperm.xlu0 %2404, %v2164_v0   ;;  %v2811_v63 = vsel %vm364_vm6, %v346_v32, %v382_v47  ;;  %v883_v0 = vmul.f32 0.1, %v851_v48  ;;  %vm351_vm13 = vcmp.gt.f32.partialorder %v333_v4, 0.0  ;;  %v369_v18 = vmul.f32 0.1, %v333_v4 }
  0x79   : > { %v2841_v32 = vsel %vm353_vm12, %v335_v1, %v371_v15  ;;  %v863_v47 = vadd.f32 %v2749_v58, %v847_v23  ;;  %v2870_v11 = vsel %vm873_vm0, %v857_v29, %v889_v53  ;;  %v347_v12 = vadd.f32 %v2749_v58, %v322_v54 }
  0x7a   : > { %v2823_v13 = vsel %vm867_vm9, %v851_v48, %v883_v0  ;;  %v2848_v36 = vsel %vm351_vm13, %v333_v4, %v369_v18  ;;  %v314_v48 = vmul.f32 %v2736_v50, %v289_v24  ;;  %v897_v0 = vmul.f32 0.1, %v865_v37  ;;  %v2109_v4 = vld [vmem:[%s2717_s29 + $0xa4] sm:$0x1] }
  0x7b   : > { %v895_v1 = vmul.f32 0.1, %v863_v47  ;;  %vm879_vm3 = vcmp.gt.f32.partialorder %v863_v47, 0.0  ;;  %v830_v15 = vunpack.c.l.bf16 %v2115_v61  ;;  %v824_v19 = vunpack.c.l.bf16 %v2109_v4 }
  0x7c   : > { %767 = vperm.xlu0 %2404, %v2102_v10   ;;  %v893_v10 = vmul.f32 0.1, %v861_v60  ;;  %v339_v2 = vadd.f32 %v2749_v58, %v314_v48  ;;  %v2880_v20 = vsel %vm881_vm2, %v865_v37, %v897_v0  ;;  %v373_v23 = vmul.f32 0.1, %v337_v5  ;;  %v2076_v48 = vld [vmem:[%s2717_s29 + $0x50] ss:$24 sps:$4 sm:$0xff]  }
  0x7d   : > { %v2882_v21 = vsel %vm879_vm3, %v863_v47, %v895_v1  ;;  %v348_v24 = vadd.f32 %v2749_v58, %v323_v7  ;;  %vm365_vm6 = vcmp.gt.f32.partialorder %v347_v12, 0.0  ;;  %v383_v30 = vmul.f32 0.1, %v347_v12 }
  0x7e   : > { %v2834_v28 = vsel %vm877_vm10, %v861_v60, %v893_v10  ;;  %v836_v60 = vmul.f32 %v2736_v50, %v820_v40  ;;  %vm357_vm4 = vcmp.gt.f32.partialorder %v339_v2, 0.0  ;;  %v375_v22 = vmul.f32 0.1, %v339_v2 }
  0x7f   : > { %v846_v34 = vmul.f32 %v2736_v50, %v830_v15  ;;  %v381_v37 = vmul.f32 0.1, %v345_v17  ;;  %v840_v39 = vmul.f32 %v2736_v50, %v824_v19  ;;  %vm366_vm9 = vcmp.gt.f32.partialorder %v348_v24, 0.0  ;;  %v2946_v19 = vld [vmem:[%s2717_s29 + $0xcc] sm:$0x1] }
  0x80   : > { %v852_v18 = vadd.f32 %v2749_v58, %v836_v60  ;;  %v384_v51 = vmul.f32 0.1, %v348_v24  ;;  %v854_v53 = vadd.f32 %v2749_v58, %v838_v25  ;;  %v558_v60 = vunpack.c.h.bf16 %v2845_v35 }
  0x81   : > { %v566_v61 = vunpack.c.h.bf16 %v2076_v48  ;;  %v2917_v0 = vsel %vm357_vm4, %v339_v2, %v375_v22  ;;  %v2920_v1 = vsel %vm355_vm5, %v337_v5, %v373_v23  ;;  %v2923_v4 = vsel %vm365_vm6, %v347_v12, %v383_v30  ;;  %v2940_v12 = vld [vmem:[%s2717_s29 + $0xac] sm:$0x1] }
  0x82   : > { %vm868_vm8 = vcmp.gt.f32.partialorder %v852_v18, 0.0  ;;  %v884_v49 = vmul.f32 0.1, %v852_v18  ;;  %vm876_vm10 = vcmp.gt.f32.partialorder %v860_v33, 0.0  ;;  %v886_v35 = vmul.f32 0.1, %v854_v53 }
  0x83   : > { %v832_v7 = vunpack.c.l.bf16 %v2117_v57  ;;  %v2934_v5 = vsel %vm366_vm9, %v348_v24, %v384_v51  ;;  %vm870_vm11 = vcmp.gt.f32.partialorder %v854_v53, 0.0  ;;  %v2942_v14 = vsel %vm876_vm10, %v860_v33, %v892_v56 }
  0x84   : > { %v2931_v2 = vsel %vm868_vm8, %v852_v18, %v884_v49  ;;  %v584_v22 = vmul.f32 %v2736_v50, %v566_v61  ;;  %v560_v25 = vunpack.c.l.bf16 %v2076_v48  ;;  %vm1311_vm0 = vsmask.f32 7440 }
  0x85   : > { %vm3030_vm1 = vmor %vm1310_vm15, %vm1311_vm0 }
  0x97   : > { %v465_v9 = vpop.permute.xlu1 %464  ;;  %v425_v10 = vpop.permute.xlu0 %424 }
  0x98   : > { %v2890_v40 = vmul.f32 %v465_v9, %v2780_v26  ;;  %v2893_v43 = vmul.f32 %v425_v10, %v2791_v41  ;;  %v2937_v10 = vadd.f32 %v2749_v58, %v840_v39 }
  0x9a   : > { %3530 = vst [vmem:[#allocation6_spill] sm:$0xff] %v2890_v40  ;;  %3531 = vst [vmem:[#allocation7_spill] sm:$0xff] %v2893_v43  ;;  %v2250_v18 = vpack.c.bf16 %v2893_v43, %v2893_v43  ;;  %v2258_v56 = vpack.c.bf16 %v2890_v40, %v2890_v40 }
  0x9b   : > { %v475_v27 = vpop.permute.xlu1 %474  ;;  %v435_v29 = vpop.permute.xlu0 %434  ;;  %3536 = vst [vmem:[#allocation12_spill] sm:$0xff] %v2937_v10 }
  0x9c   : > { %v2896_v45 = vmul.f32 %v475_v27, %v2787_v38  ;;  %v2899_v47 = vmul.f32 %v435_v29, %v2794_v42  ;;  %v862_v38 = vadd.f32 %v2749_v58, %v846_v34  ;;  %v2957_v27 = vsel %vm870_vm11, %v854_v53, %v886_v35 }
  0x9d   : > { %v2960_v29 = vmul.f32 %v2736_v50, %v832_v7  ;;  %v602_v53 = vadd.f32 %v2749_v58, %v584_v22  ;;  %v1314_v57 = vshrl.u32 %v2250_v18, 16  ;;  %v1317_v61 = vshll.u32 %v2250_v18, 16 }
  0x9e   : > { %3532 = vst [vmem:[#allocation8_spill] sm:$0xff] %v2896_v45  ;;  %3533 = vst [vmem:[#allocation9_spill] sm:$0xff] %v2899_v47  ;;  %v894_v15 = vmul.f32 0.1, %v862_v38  ;;  %vm878_vm12 = vcmp.gt.f32.partialorder %v862_v38, 0.0  ;;  %v2252_v33 = vpack.c.bf16 %v2899_v47, %v2899_v47 }
  0x9f   : > { %v455_v41 = vpop.permute.xlu1 %454  ;;  %v445_v55 = vpop.permute.xlu0 %444  ;;  %3539 = vst [vmem:[#allocation15_spill] sm:$0xff] %v2960_v29  ;;  %vm620_vm14 = vcmp.gt.f32.partialorder %v602_v53, 0.0  ;;  %v638_v18 = vmul.f32 0.1, %v602_v53  ;;  %v1316_v54 = vrot.slane %v1314_v57, 4  ;;  %v1319_v26 = vrot.slane %v1317_v61, 5 }
  0xa0   : > { %v2910_v42 = vmul.f32 %v455_v41, %v2799_v46  ;;  %v2913_v59 = vmul.f32 %v445_v55, %v2804_v52  ;;  %v2928_v52 = vsel %vm363_vm7, %v345_v17, %v381_v37  ;;  %v576_v17 = vmul.f32 %v2736_v50, %v558_v60  ;;  %v281_v41 = vld [vmem:[%s2717_s29 + $0x44] sm:$0x1]  ;;  %v2980_v55 = vld [vmem:[%s2717_s29 + $0x60] ss:$16 sps:$4 sm:$0xff]  }
  0xa1   : > { %v2985_v60 = vsel %vm878_vm12, %v862_v38, %v894_v15  ;;  %v568_v38 = vunpack.c.h.bf16 %v2980_v55 }
  0xa2   : > { %3534 = vst [vmem:[#allocation10_spill] sm:$0xff] %v2910_v42  ;;  %3535 = vst [vmem:[#allocation11_spill] sm:$0xff] %v2913_v59  ;;  %v594_v51 = vadd.f32 %v2749_v58, %v576_v17 }
  0xa3   : > { %v495_v8 = vpop.permute.xlu1 %494  ;;  %v485_v9 = vpop.permute.xlu0 %484 }
  0xa4   : > { %v2952_v23 = vmul.f32 %v495_v8, %v2811_v63  ;;  %v2955_v24 = vmul.f32 %v485_v9, %v2814_v3  ;;  %v1328_v8 = vshrl.u32 %v2252_v33, 16  ;;  %v1331_v9 = vshll.u32 %v2252_v33, 16 }
  0xa5   : > { %vm612_vm13 = vcmp.gt.f32.partialorder %v594_v51, 0.0  ;;  %v630_v15 = vmul.f32 0.1, %v594_v51 }
  0xa6   : > { %3537 = vst [vmem:[#allocation13_spill] sm:$0xff] %v2952_v23  ;;  %3538 = vst [vmem:[#allocation14_spill] sm:$0xff] %v2955_v24  ;;  %v1330_v39 = vrot.slane %v1328_v8, 4 }
  0xa7   : > { %v945_v34 = vpop.permute.xlu1 %944  ;;  %v935_v3 = vpop.permute.xlu0 %934 }
  0xa8   : > { %v2971_v48 = vmul.f32 %v945_v34, %v2817_v6  ;;  %v2974_v49 = vmul.f32 %v935_v3, %v2823_v13  ;;  %v578_v6 = vmul.f32 %v2736_v50, %v560_v25  ;;  %v2260_v13 = vpack.c.bf16 %v2896_v45, %v2896_v45 }
  0xa9   : > { %v299_v34 = vunpack.c.l.bf16 %v281_v41  ;;  %v1370_v25 = vshrl.u32 %v2258_v56, 16  ;;  %v1373_v3 = vshll.u32 %v2258_v56, 16  ;;  %v1333_v41 = vrot.slane %v1331_v9, 5 }
  0xaa   : > { %v1384_v33 = vshrl.u32 %v2260_v13, 16  ;;  %v1387_v7 = vshll.u32 %v2260_v13, 16  ;;  %v3011_v57 = vadd.f32 %v2749_v58, %v578_v6  ;;  %v1320_v9 = vor.u32 %v1319_v26, %v1316_v54 }
  0xab   : > { %v985_v17 = vpop.permute.xlu1 %984  ;;  %v975_v22 = vpop.permute.xlu0 %974  ;;  %v1372_v61 = vrot.slane %v1370_v25, 4  ;;  %v324_v13 = vmul.f32 %v2736_v50, %v299_v34  ;;  %v1375_v8 = vrot.slane %v1373_v3, 5  ;;  %v2254_v25 = vpack.c.bf16 %v2913_v59, %v2913_v59 }
  0xac   : > { %v2996_v63 = vmul.f32 %v985_v17, %v2834_v28  ;;  %v2999_v46 = vmul.f32 %v975_v22, %v2838_v31  ;;  %v3008_v31 = vsel %vm612_vm13, %v594_v51, %v630_v15  ;;  %v1386_v56 = vrot.slane %v1384_v33, 4 }
  0xad   : > { %v1389_v43 = vrot.slane %v1387_v7, 5  ;;  %v2264_v54 = vpack.c.bf16 %v2952_v23, %v2952_v23  ;;  %v3023_v26 = vsel %vm620_vm14, %v602_v53, %v638_v18  ;;  %vm614_vm2 = vcmp.gt.f32.partialorder %v3011_v57, 0.0 }
  0xae   : > { %3540 = vst [vmem:[#allocation16_spill] sm:$0xff] %v2996_v63  ;;  %3541 = vst [vmem:[#allocation17_spill] sm:$0xff] %v2999_v46 }
  0xaf   : > { %v440_v37 = vpop.permute.xlu1 %439  ;;  %v430_v30 = vpop.permute.xlu0 %429 }
  0xb0   : > { %v515_v28 = vmul.f32 %v440_v37, %v2841_v32  ;;  %v513_v17 = vmul.f32 %v430_v30, %v2848_v36  ;;  %v1334_v32 = vor.u32 %v1333_v41, %v1330_v39  ;;  %v2256_v36 = vpack.c.bf16 %v2910_v42, %v2910_v42 }
  0xb1   : > { %v3026_v39 = vmul.f32 %v2736_v50, %v568_v38  ;;  %v1321_v41 = vrot.slane %v1320_v9, 4  ;;  %v3055_v42 = vmul.f32 0.1, %v3011_v57 }
  0xb2   : > { %v2253_v22 = vpack.c.bf16 %v515_v28, %v515_v28  ;;  %v2251_v35 = vpack.c.bf16 %v513_v17, %v513_v17  ;;  %v1390_v28 = vor.u32 %v1389_v43, %v1386_v56  ;;  %v1335_v18 = vrot.slane %v1334_v32, 4 }
  0xb3   : > { %v480_v30 = vpop.permute.xlu1 %479  ;;  %v470_v37 = vpop.permute.xlu0 %469  ;;  %v1356_v38 = vshrl.u32 %v2256_v36, 16  ;;  %v1345_v56 = vshll.u32 %v2254_v25, 16  ;;  %v1415_v32 = vshll.u32 %v2264_v54, 16 }
  0xb4   : > { %v1337_v51 = vshll.u32 %v2253_v22, 16  ;;  %v1323_v6 = vshll.u32 %v2251_v35, 16  ;;  %v523_v15 = vmul.f32 %v480_v30, %v2852_v44  ;;  %v521_v34 = vmul.f32 %v470_v37, %v2863_v62  ;;  %v3573_v44 = vld [vmem:[#allocation13_spill] sm:$0xff] }
  0xb5   : > { %v1376_v62 = vor.u32 %v1375_v8, %v1372_v61  ;;  %v2262_v22 = vpack.c.bf16 %v2955_v24, %v2955_v24  ;;  %v1412_v61 = vshrl.u32 %v2264_v54, 16  ;;  %v2268_v54 = vpack.c.bf16 %v2971_v48, %v2971_v48 }
  0xb6   : > { %v1339_v7 = vrot.slane %v1337_v51, 5  ;;  %v1325_v3 = vrot.slane %v1323_v6, 5  ;;  %v2261_v33 = vpack.c.bf16 %v523_v15, %v523_v15  ;;  %v2259_v35 = vpack.c.bf16 %v521_v34, %v521_v34 }
  0xb7   : > { %v3034_v17 = vpop.permute.xlu1 %964  ;;  %v3036_v53 = vpop.permute.xlu0 %954  ;;  %v1359_v51 = vshll.u32 %v2256_v36, 16  ;;  %v1342_v6 = vshrl.u32 %v2254_v25, 16  ;;  %v1377_v36 = vrot.slane %v1376_v62, 4  ;;  %v3058_v25 = vadd.f32 %v2749_v58, %v324_v13 }
  0xb8   : > { %v1393_v30 = vshll.u32 %v2261_v33, 16  ;;  %v1379_v37 = vshll.u32 %v2259_v35, 16  ;;  %v3042_v15 = vsel %vm3030_vm1, %v1321_v41, %v1325_v3  ;;  %v3046_v43 = vsel %vm3030_vm1, %v1335_v18, %v1339_v7 }
  0xb9   : > { %3544 = vst [vmem:[#allocation18_spill] sm:$0xff] %v3042_v15  ;;  %v1391_v35 = vrot.slane %v1390_v28, 4  ;;  %v1398_v41 = vshrl.u32 %v2262_v22, 16  ;;  %v1401_v18 = vshll.u32 %v2262_v22, 16  ;;  %v1361_v3 = vrot.slane %v1359_v51, 5 }
  0xba   : > { %v1395_v8 = vrot.slane %v1393_v30, 5  ;;  %v1381_v9 = vrot.slane %v1379_v37, 5  ;;  %v3064_v30 = vld [vmem:[%s2717_s29 + $0x58] ss:$40 sps:$4 sm:$0xff]   ;;  %v1358_v37 = vrot.slane %v1356_v38, 4  ;;  %v1344_v13 = vrot.slane %v1342_v6, 4 }
  0xbb   : > { %v3048_v34 = vpop.permute.xlu1 %1004  ;;  %v3050_v33 = vpop.permute.xlu0 %994  ;;  %v1347_v15 = vrot.slane %v1345_v56, 5  ;;  %v1414_v40 = vrot.slane %v1412_v61, 4  ;;  %v1417_v7 = vrot.slane %v1415_v32, 5  ;;  %v2266_v22 = vpack.c.bf16 %v2974_v49, %v2974_v49 }
  0xbc   : > { %3545 = vst [vmem:[#allocation19_spill] sm:$0xff] %v3050_v33  ;;  %v3068_v62 = vsel %vm3030_vm1, %v1377_v36, %v1381_v9  ;;  %v3072_v28 = vsel %vm3030_vm1, %v1391_v35, %v1395_v8  ;;  %v1400_v9 = vrot.slane %v1398_v41, 4  ;;  %v1403_v51 = vrot.slane %v1401_v18, 5 }
  0xbd   : > { %v1480_v6 = vshrl.u32 %v2268_v54, 16  ;;  %v1483_v56 = vshll.u32 %v2268_v54, 16  ;;  %v2276_v61 = vpack.c.bf16 %v2996_v63, %v2996_v63  ;;  %v1362_v32 = vor.u32 %v1361_v3, %v1358_v37 }
  0xbe   : > { %v1348_v35 = vor.u32 %v1347_v15, %v1344_v13  ;;  %v1418_v29 = vor.u32 %v1417_v7, %v1414_v40  ;;  %v1466_v33 = vshrl.u32 %v2266_v22, 16  ;;  %v1469_v47 = vshll.u32 %v2266_v22, 16 }
  0xbf   : > { %v460_v45 = vpop.permute.xlu1 %459  ;;  %v450_v24 = vpop.permute.xlu0 %449  ;;  %v1404_v38 = vor.u32 %v1403_v51, %v1400_v9  ;;  %v3087_v63 = vrot.slane %v1480_v6, 4  ;;  %v1485_v15 = vrot.slane %v1483_v56, 5  ;;  %v1536_v3 = vshrl.u32 %v2276_v61, 16 }
  0xc0   : > { %v519_v36 = vmul.f32 %v460_v45, %v2917_v0  ;;  %v517_v8 = vmul.f32 %v450_v24, %v2920_v1  ;;  %v2274_v45 = vpack.c.bf16 %v2999_v46, %v2999_v46  ;;  %v1539_v22 = vshll.u32 %v2276_v61, 16 }
  0xc1   : > { %v1405_v6 = vrot.slane %v1404_v38, 4  ;;  %vm367_vm3 = vcmp.gt.f32.partialorder %v3058_v25, 0.0 }
  0xc2   : > { %v2257_v59 = vpack.c.bf16 %v519_v36, %v519_v36  ;;  %v2255_v10 = vpack.c.bf16 %v517_v8, %v517_v8  ;;  %v1522_v36 = vshrl.u32 %v2274_v45, 16  ;;  %v1525_v51 = vshll.u32 %v2274_v45, 16  ;;  %v2140_v45 = vld [vmem:[%s2717_s29 + $0xe8] ss:$40 sps:$4 sm:$0xff]  }
  0xc3   : > { %v500_v0 = vpop.permute.xlu1 %499  ;;  %v490_v1 = vpop.permute.xlu0 %489 }
  0xc4   : > { %v1365_v24 = vshll.u32 %v2257_v59, 16  ;;  %v1351_v41 = vshll.u32 %v2255_v10, 16  ;;  %v527_v18 = vmul.f32 %v500_v0, %v2923_v4  ;;  %v525_v54 = vmul.f32 %v490_v1, %v2928_v52 }
  0xc5   : > { %v1349_v59 = vrot.slane %v1348_v35, 4  ;;  %v1363_v10 = vrot.slane %v1362_v32, 4 }
  0xc6   : > { %v1367_v37 = vrot.slane %v1365_v24, 5  ;;  %v1353_v40 = vrot.slane %v1351_v41, 5  ;;  %v2265_v7 = vpack.c.bf16 %v527_v18, %v527_v18  ;;  %v2263_v13 = vpack.c.bf16 %v525_v54, %v525_v54 }
  0xc7   : > { %v940_v8 = vpop.permute.xlu1 %939  ;;  %v505_v46 = vpop.permute.xlu0 %504  ;;  %v1419_v24 = vrot.slane %v1418_v29, 4  ;;  %v1486_v18 = vor.u32 %v1485_v15, %v3087_v63  ;;  %v1468_v54 = vrot.slane %v1466_v33, 4 }
  0xc8   : > { %v1421_v4 = vshll.u32 %v2265_v7, 16  ;;  %v1407_v0 = vshll.u32 %v2263_v13, 16  ;;  %v1013_v52 = vmul.f32 %v940_v8, %v2931_v2  ;;  %v3092_v9 = vmul.f32 %v505_v46, %v2934_v5  ;;  %v3114_v13 = vld [vmem:[%s2717_s29 + $0x78] ss:$104 sps:$4 sm:$0xff]  }
  0xc9   : > { %v3096_v56 = vsel %vm3030_vm1, %v1349_v59, %v1353_v40  ;;  %v3100_v61 = vsel %vm3030_vm1, %v1363_v10, %v1367_v37  ;;  %v1471_v37 = vrot.slane %v1469_v47, 5  ;;  %v1538_v40 = vrot.slane %v1536_v3, 4 }
  0xca   : > { %v1423_v1 = vrot.slane %v1421_v4, 5  ;;  %v1409_v32 = vrot.slane %v1407_v0, 5  ;;  %v2267_v35 = vpack.c.bf16 %v1013_v52, %v1013_v52  ;;  %v1541_v10 = vrot.slane %v1539_v22, 5  ;;  %v2144_v0 = vld [vmem:[%s2717_s29 + $0xf0] ss:$8 sps:$4 sm:$0xff]  }
  0xcb   : > { %v980_v46 = vpop.permute.xlu1 %979  ;;  %v950_v5 = vpop.permute.xlu0 %949  ;;  %v1524_v4 = vrot.slane %v1522_v36, 4  ;;  %v1527_v47 = vrot.slane %v1525_v51, 5  ;;  %v1472_v52 = vor.u32 %v1471_v37, %v1468_v54  ;;  %v570_v22 = vunpack.c.l.bf16 %v3114_v13 }
  0xcc   : > { %v1021_v29 = vmul.f32 %v980_v46, %v2942_v14  ;;  %v1015_v7 = vmul.f32 %v950_v5, %v2957_v27  ;;  %v3118_v8 = vsel %vm3030_vm1, %v1405_v6, %v1409_v32  ;;  %v3122_v59 = vsel %vm3030_vm1, %v1419_v24, %v1423_v1 }
  0xcd   : > { %v1475_v63 = vshll.u32 %v2267_v35, 16  ;;  %v572_v1 = vunpack.c.h.bf16 %v3064_v30  ;;  %v604_v51 = vadd.f32 %v2749_v58, %v3026_v39  ;;  %v3546_v35 = vunpack.c.l.bf16 %v2980_v55 }
  0xce   : > { %v2275_v33 = vpack.c.bf16 %v1021_v29, %v1021_v29  ;;  %v2269_v15 = vpack.c.bf16 %v1015_v7, %v1015_v7  ;;  %v3547_v54 = vunpack.c.l.bf16 %v3064_v30  ;;  %v1487_v29 = vrot.slane %v1486_v18, 4 }
  0xcf   : > { %v3124_v14 = vpop.permute.xlu1 %959  ;;  %v990_v3 = vpop.permute.xlu0 %989  ;;  %v582_v24 = vmul.f32 %v2736_v50, %v3546_v35  ;;  %v1477_v46 = vrot.slane %v1475_v63, 5  ;;  %v1542_v7 = vor.u32 %v1541_v10, %v1538_v40  ;;  %v1473_v63 = vrot.slane %v1472_v52, 4 }
  0xd0   : > { %v1023_v6 = vmul.f32 %v990_v3, %v2985_v60  ;;  %v1531_v36 = vshll.u32 %v2275_v33, 16  ;;  %v1489_v32 = vshll.u32 %v2269_v15, 16  ;;  %v650_v60 = vsel %vm614_vm2, %v3011_v57, %v3055_v42 }
  0xd1   : > { %v580_v37 = vmul.f32 %v2736_v50, %v3547_v54  ;;  %v1528_v33 = vor.u32 %v1527_v47, %v1524_v4  ;;  %v588_v35 = vmul.f32 %v2736_v50, %v570_v22  ;;  %v385_v57 = vmul.f32 0.1, %v3058_v25  ;;  %v3161_v4 = vld [vmem:[%s2717_s29 + $0xd8] ss:$40 sps:$4 sm:$0xff]  }
  0xd2   : > { %v2277_v5 = vpack.c.bf16 %v1023_v6, %v1023_v6  ;;  %v1491_v39 = vrot.slane %v1489_v32, 5  ;;  %v590_v6 = vmul.f32 %v2736_v50, %v572_v1  ;;  %v1533_v42 = vrot.slane %v1531_v36, 5 }
  0xd3   : > { %v3145_v15 = vpop.permute.xlu1 %999  ;;  %v3147_v55 = vpop.permute.xlu0 %969  ;;  %v2282_v18 = vpack.c.bf16 %v3092_v9, %v3092_v9  ;;  %v600_v10 = vadd.f32 %v2749_v58, %v582_v24  ;;  %v3165_v47 = vsel %vm3030_vm1, %v1473_v63, %v1477_v46  ;;  %v1543_v52 = vrot.slane %v1542_v7, 4 }
  0xd4   : > { %v1545_v3 = vshll.u32 %v2277_v5, 16  ;;  %v3155_v30 = vsel %vm3030_vm1, %v1487_v29, %v1491_v39  ;;  %v1529_v1 = vrot.slane %v1528_v33, 4  ;;  %v598_v32 = vadd.f32 %v2749_v58, %v580_v37 }
  0xd5   : > { %vm622_vm4 = vcmp.gt.f32.partialorder %v604_v51, 0.0  ;;  %v640_v54 = vmul.f32 0.1, %v604_v51  ;;  %v608_v24 = vadd.f32 %v2749_v58, %v590_v6  ;;  %v606_v29 = vadd.f32 %v2749_v58, %v588_v35 }
  0xd6   : > { %v1547_v40 = vrot.slane %v1545_v3, 5  ;;  %v1055_v39 = vunpack.c.h.bf16 %v3114_v13  ;;  %v1053_v46 = vunpack.c.l.bf16 %v3161_v4  ;;  %v3178_v7 = vsel %vm3030_vm1, %v1529_v1, %v1533_v42 }
  0xd7   : > { %v688_v22 = vpop.permute.xlu1 %687  ;;  %v3167_v36 = vpop.permute.xlu0 %1009  ;;  %v1583_v33 = vshrl.u32 %v2282_v18, 16  ;;  %v1586_v63 = vshll.u32 %v2282_v18, 16  ;;  %v403_v3 = vsel %vm367_vm3, %v3058_v25, %v385_v57  ;;  %vm618_vm5 = vcmp.gt.f32.partialorder %v600_v10, 0.0 }
  0xd8   : > { %v3182_v37 = vsel %vm3030_vm1, %v1543_v52, %v1547_v40  ;;  %v636_v42 = vmul.f32 0.1, %v600_v10  ;;  %vm616_vm6 = vcmp.gt.f32.partialorder %v598_v32, 0.0  ;;  %v634_v1 = vmul.f32 0.1, %v598_v32 }
  0xd9   : > { %v775_v41 = vmul.f32 %v688_v22, %v3008_v31  ;;  %v658_v52 = vsel %vm622_vm4, %v604_v51, %v640_v54  ;;  %v644_v18 = vmul.f32 0.1, %v608_v24  ;;  %vm626_vm7 = vcmp.gt.f32.partialorder %v608_v24, 0.0 }
  0xda   : > { %vm624_vm8 = vcmp.gt.f32.partialorder %v606_v29, 0.0  ;;  %v1071_v25 = vmul.f32 %v2736_v50, %v1055_v39  ;;  %v1069_v57 = vmul.f32 %v2736_v50, %v1053_v46  ;;  %v1585_v2 = vrot.slane %v1583_v33, 4 }
  0xdb   : > { %v728_v6 = vpop.permute.xlu1 %727  ;;  %v698_v35 = vpop.permute.xlu0 %697  ;;  %v1588_v5 = vrot.slane %v1586_v63, 5  ;;  %v642_v38 = vmul.f32 0.1, %v606_v29  ;;  %v1061_v22 = vunpack.c.h.bf16 %v2144_v0  ;;  %v1059_v51 = vunpack.c.l.bf16 %v2144_v0 }
  0xdc   : > { %v3190_v40 = vmul.f32 %v698_v35, %v650_v60  ;;  %v1063_v60 = vunpack.c.h.bf16 %v3161_v4  ;;  %v1057_v54 = vunpack.c.l.bf16 %v2140_v45  ;;  %v3200_v35 = vmul.f32 %v728_v6, %v3023_v26 }
  0xdd   : > { %v654_v50 = vsel %vm618_vm5, %v600_v10, %v636_v42  ;;  %v662_v46 = vsel %vm626_vm7, %v608_v24, %v644_v18  ;;  %v1087_v4 = vadd.f32 %v2749_v58, %v1071_v25  ;;  %v1085_v0 = vadd.f32 %v2749_v58, %v1069_v57  ;;  %v3217_v10 = vld [vmem:[%s3504_s1] ss:$0 sm:$0xff] }
  0xde   : > { %v2288_v13 = vpack.c.bf16 %v3190_v40, %v775_v41  ;;  %v652_v41 = vsel %vm616_vm6, %v598_v32, %v634_v1  ;;  %v1589_v33 = vor.u32 %v1588_v5, %v1585_v2  ;;  %v1079_v32 = vmul.f32 %v3217_v10, %v1063_v60 }
  0xdf   : > { %v510_v27 = vpop.permute.xlu1 %509  ;;  %v738_v31 = vpop.permute.xlu0 %737  ;;  %v1077_v24 = vmul.f32 %v3217_v10, %v1061_v22  ;;  %v1075_v58 = vmul.f32 %v3217_v10, %v1059_v51  ;;  %vm1103_vm9 = vcmp.gt.f32.partialorder %v1087_v4, 0.0  ;;  %v1119_v42 = vmul.f32 0.1, %v1087_v4  ;;  %v3233_v22 = vld [vmem:[%s3505_s2] ss:$0 sm:$0xff] }
  0xe0   : > { %v529_v23 = vmul.f32 %v510_v27, %v403_v3  ;;  %v3202_v39 = vmul.f32 %v738_v31, %v658_v52  ;;  %1620 = vrot.lane.b32.xlu1 %v2288_v13, %s2492_s14  ;;  %v660_v27 = vsel %vm624_vm8, %v606_v29, %v642_v38  ;;  %v2148_v3 = vld [vmem:[%s2717_s29 + $0x108] sm:$0xf]  ;;  %v1067_v29 = vunpack.c.h.bf16 %v2140_v45 }
  0xe1   : > { %vm1101_vm10 = vcmp.gt.f32.partialorder %v1085_v0, 0.0  ;;  %v1065_v1 = vunpack.c.l.bf16 %v2148_v3  ;;  %v1590_v52 = vrot.slane %v1589_v33, 4  ;;  %v1117_v57 = vmul.f32 0.1, %v1085_v0 }
  0xe2   : > { %v2283_v63 = vpack.c.bf16 %v529_v23, %v529_v23  ;;  %v2290_v26 = vpack.c.bf16 %v3202_v39, %v3200_v35  ;;  %v1073_v23 = vmul.f32 %v3217_v10, %v1057_v54  ;;  %v1095_v51 = vadd.f32 %v3233_v22, %v1079_v32 }
  0xe3   : > { %v718_v6 = vpop.permute.xlu1 %717  ;;  %v708_v13 = vpop.permute.xlu0 %707  ;;  %v1093_v45 = vadd.f32 %v3233_v22, %v1077_v24  ;;  %v1091_v54 = vadd.f32 %v3233_v22, %v1075_v58  ;;  %v3251_v3 = vmul.f32 %v3034_v17, %v2870_v11  ;;  %v3549_v24 = vunpack.c.l.bf16 %v2946_v19 }
  0xe4   : > { %v1592_v2 = vshll.u32 %v2283_v63, 16  ;;  %v3223_v5 = vmul.f32 %v718_v6, %v654_v50  ;;  %v3225_v38 = vmul.f32 %v708_v13, %v652_v41  ;;  %1624 = vrot.lane.b32.xlu0 %v2290_v26, %s2492_s14  ;;  %v1089_v50 = vadd.f32 %v3233_v22, %v1073_v23 }
  0xe5   : > { %v1083_v63 = vmul.f32 %v3217_v10, %v1067_v29  ;;  %v3255_v6 = vmul.f32 %v3036_v53, %v2875_v16  ;;  %v3548_v13 = vunpack.c.l.bf16 %v2940_v12  ;;  %v850_v58 = vmul.f32 %v3217_v10, %v3549_v24 }
  0xe6   : > { %v1594_v18 = vrot.slane %v1592_v2, 5  ;;  %v2289_v25 = vpack.c.bf16 %v3223_v5, %v3225_v38  ;;  %v1135_v17 = vsel %vm1103_vm9, %v1087_v4, %v1119_v42  ;;  %v1133_v23 = vsel %vm1101_vm10, %v1085_v0, %v1117_v57 }
  0xe7   : > { %v758_v31 = vpop.permute.xlu1 %757  ;;  %v748_v60 = vpop.permute.xlu0 %747  ;;  %v842_v32 = vmul.f32 %v3217_v10, %v3548_v13  ;;  %vm1111_vm11 = vcmp.gt.f32.partialorder %v1095_v51, 0.0  ;;  %v1127_v2 = vmul.f32 0.1, %v1095_v51  ;;  %v1125_v29 = vmul.f32 0.1, %v1093_v45 }
  0xe8   : > { %v3239_v41 = vmul.f32 %v758_v31, %v662_v46  ;;  %v3241_v33 = vmul.f32 %v748_v60, %v660_v27  ;;  %1622 = vrot.lane.b32.xlu1 %v2289_v25, %s2492_s14  ;;  %v3247_v26 = vsel %vm3030_vm1, %v1590_v52, %v1594_v18  ;;  %v1081_v46 = vmul.f32 %v3217_v10, %v1065_v1  ;;  %v3551_v18 = vld [vmem:[#allocation19_spill] sm:$0xff] }
  0xe9   : > { %v2237_v27 = vcombine.low %v3122_v59, %v3247_v26  ;;  %v3550_v12 = vpack.c.bf16 %v2971_v48, %v2974_v49  ;;  %vm1109_vm12 = vcmp.gt.f32.partialorder %v1093_v45, 0.0  ;;  %vm1107_vm13 = vcmp.gt.f32.partialorder %v1091_v54, 0.0 }
  0xea   : > { %v2291_v11 = vpack.c.bf16 %v3239_v41, %v3241_v33  ;;  %v1123_v19 = vmul.f32 0.1, %v1091_v54  ;;  %v1121_v1 = vmul.f32 0.1, %v1089_v50  ;;  %v2293_v4 = vpack.c.bf16 %v3251_v3, %v3255_v6 }
  0xeb   : > { %v1179_v16 = vpop.permute.xlu1 %1178  ;;  %v1169_v53 = vpop.permute.xlu0 %1168  ;;  %vm1105_vm14 = vcmp.gt.f32.partialorder %v1089_v50, 0.0  ;;  %v1099_v0 = vadd.f32 %v3233_v22, %v1083_v63  ;;  %v1097_v42 = vadd.f32 %v3233_v22, %v1081_v46  ;;  %v1026_v52 = vmul.f32 %v3048_v34, %v2880_v20  ;;  %v3553_v20 = vld [vmem:[#allocation16_spill] sm:$0xff]  ;;  %v3554_v34 = vld [vmem:[#allocation17_spill] sm:$0xff] }
  0xec   : > { %1626 = vrot.lane.b32.xlu0 %v2291_v11, %s2492_s14  ;;  %1652 = vrot.lane.b32.xlu1 %v3550_v12, %s2493_s27  ;;  %v1024_v25 = vmul.f32 %v3551_v18, %v2882_v21  ;;  %v1248_v48 = vmul.f32 %v1179_v16, %v1135_v17  ;;  %v1246_v49 = vmul.f32 %v1169_v53, %v1133_v23  ;;  %v3552_v11 = vld [vmem:[#allocation15_spill] sm:$0xff]  ;;  %vm1747_vm7 = vcmask 31744  }
  0xed   : > { %v858_v57 = vadd.f32 %v3233_v22, %v842_v32  ;;  %v866_v31 = vadd.f32 %v3233_v22, %v850_v58  ;;  %v1143_v13 = vsel %vm1111_vm11, %v1095_v51, %v1127_v2  ;;  %v1141_v63 = vsel %vm1109_vm12, %v1093_v45, %v1125_v29 }
  0xee   : > { %v864_v46 = vadd.f32 %v3233_v22, %v3552_v11  ;;  %v3555_v12 = vpack.c.bf16 %v3553_v20, %v3554_v34  ;;  %v1139_v21 = vsel %vm1107_vm13, %v1091_v54, %v1123_v19  ;;  %v1137_v32 = vsel %vm1105_vm14, %v1089_v50, %v1121_v1  ;;  %v3556_v19 = vld [vmem:[#allocation12_spill] sm:$0xff] }
  0xef   : > { %v1219_v60 = vpop.permute.xlu1 %1218  ;;  %v1209_v24 = vpop.permute.xlu0 %1208  ;;  %vm1115_vm15 = vcmp.gt.f32.partialorder %v1099_v0, 0.0  ;;  %v1131_v58 = vmul.f32 0.1, %v1099_v0  ;;  %vm1113_vm0 = vcmp.gt.f32.partialorder %v1097_v42, 0.0  ;;  %v1129_v51 = vmul.f32 0.1, %v1097_v42 }
  0xf0   : > { %1656 = vrot.lane.b32.xlu0 %v3555_v12, %s2493_s27  ;;  %1654 = vrot.lane.b32.xlu1 %v2293_v4, %s2493_s27  ;;  %v2295_v17 = vpack.c.bf16 %v1026_v52, %v1024_v25  ;;  %v2296_v45 = vpack.c.bf16 %v1248_v48, %v1246_v49  ;;  %v1256_v16 = vmul.f32 %v1219_v60, %v1143_v13  ;;  %v890_v23 = vmul.f32 0.1, %v858_v57 }
  0xf1   : > { %v1254_v53 = vmul.f32 %v1209_v24, %v1141_v63  ;;  %v898_v2 = vmul.f32 0.1, %v866_v31  ;;  %vm874_vm2 = vcmp.gt.f32.partialorder %v858_v57, 0.0  ;;  %vm882_vm3 = vcmp.gt.f32.partialorder %v866_v31, 0.0 }
  0xf2   : > { %v1147_v54 = vsel %vm1115_vm15, %v1099_v0, %v1131_v58  ;;  %v1145_v50 = vsel %vm1113_vm0, %v1097_v42, %v1129_v51  ;;  %v888_v1 = vmul.f32 0.1, %v3556_v19  ;;  %v896_v48 = vmul.f32 0.1, %v864_v46 }
  0xf3   : > { %v1199_v29 = vpop.permute.xlu1 %1198  ;;  %v1189_v18 = vpop.permute.xlu0 %1188  ;;  %v2298_v49 = vpack.c.bf16 %v1256_v16, %v1254_v53  ;;  %vm872_vm4 = vcmp.gt.f32.partialorder %v3556_v19, 0.0  ;;  %vm880_vm5 = vcmp.gt.f32.partialorder %v864_v46, 0.0  ;;  %v906_v13 = vsel %vm874_vm2, %v858_v57, %v890_v23  ;;  %v3557_v16 = vld [vmem:[#allocation11_spill] sm:$0xff] }
  0xf4   : > { %v1252_v11 = vmul.f32 %v1199_v29, %v1139_v21  ;;  %v1250_v4 = vmul.f32 %v1189_v18, %v1137_v32  ;;  %1658 = vrot.lane.b32.xlu0 %v2295_v17, %s2493_s27  ;;  %1680 = vrot.lane.b32.xlu1 %v2296_v45, %s2494_s7  ;;  %v914_v24 = vsel %vm882_vm3, %v866_v31, %v898_v2  ;;  %vm1760_vm8 = vcmask 64512   ;;  %s2063_s27 = sshll.u32 %s245_s24, 5 }
  0xf5   : > { %v2272_v34 = vpack.c.bf16 %v3251_v3, %v3251_v3  ;;  %v2280_v0 = vpack.c.bf16 %v1026_v52, %v1026_v52  ;;  %v2270_v42 = vpack.c.bf16 %v3255_v6, %v3255_v6  ;;  %v904_v32 = vsel %vm872_vm4, %v3556_v19, %v888_v1  ;;  %v3558_v52 = vld [vmem:[#allocation9_spill] sm:$0xff]  ;;  %v3560_v19 = vld [vmem:[#allocation14_spill] sm:$0xff]  ;;  %v3561_v1 = vld [vmem:[#allocation8_spill] sm:$0xff] }
  0xf6   : > { %v2297_v60 = vpack.c.bf16 %v1252_v11, %v1250_v4  ;;  %v912_v58 = vsel %vm880_vm5, %v864_v46, %v896_v48  ;;  %v2278_v17 = vpack.c.bf16 %v1024_v25, %v1024_v25  ;;  %v1019_v57 = vmul.f32 %v3147_v55, %v906_v13  ;;  %v2084_v4 = vld [vmem:[%s2717_s29 + $0x88] sm:$0xf]  ;;  %s2496_s29 = smov 8  }
  0xf7   : > { %v1239_v63 = vpop.permute.xlu1 %1238  ;;  %v1229_v20 = vpop.permute.xlu0 %1228  ;;  %v1027_v31 = vmul.f32 %v3167_v36, %v914_v24  ;;  %v1508_v45 = vshrl.u32 %v2272_v34, 16  ;;  %v1511_v3 = vshll.u32 %v2272_v34, 16  ;;  %v3559_v53 = vpack.c.bf16 %v3557_v16, %v3558_v52 }
  0xf8   : > { %v1260_v12 = vmul.f32 %v1239_v63, %v1147_v54  ;;  %v1258_v21 = vmul.f32 %v1229_v20, %v1145_v50  ;;  %1684 = vrot.lane.b32.xlu0 %v2298_v49, %s2494_s7  ;;  %1682 = vrot.lane.b32.xlu1 %v2297_v60, %s2494_s7  ;;  %v1564_v6 = vshrl.u32 %v2280_v0, 16  ;;  %v1567_v23 = vshll.u32 %v2280_v0, 16  ;;  %v3563_v49 = vld [vmem:[#allocation6_spill] sm:$0xff] }
  0xf9   : > { %v1017_v46 = vmul.f32 %v3124_v14, %v904_v32  ;;  %v1025_v25 = vmul.f32 %v3145_v15, %v912_v58  ;;  %v1494_v2 = vshrl.u32 %v2270_v42, 16  ;;  %v1497_v55 = vshll.u32 %v2270_v42, 16  ;;  %v3564_v60 = vld [vmem:[#allocation10_spill] sm:$0xff] }
  0xfa   : > { %v2299_v51 = vpack.c.bf16 %v1260_v12, %v1258_v21  ;;  %v1550_v29 = vshrl.u32 %v2278_v17, 16  ;;  %v1553_v36 = vshll.u32 %v2278_v17, 16  ;;  %v2273_v18 = vpack.c.bf16 %v1019_v57, %v1019_v57 }
  0xfb   : > { %v2281_v11 = vpack.c.bf16 %v1027_v31, %v1027_v31  ;;  %v1510_v54 = vrot.slane %v1508_v45, 4  ;;  %v1513_v50 = vrot.slane %v1511_v3, 5  ;;  %v3562_v48 = vpack.c.bf16 %v3560_v19, %v3561_v1 }
  0xfc   : > { %1686 = vrot.lane.b32.xlu0 %v2299_v51, %s2494_s7  ;;  %1712 = vrot.lane.b32.xlu1 %v3559_v53, %s2495_s8  ;;  %v3565_v14 = vpack.c.bf16 %v3563_v49, %v3564_v60  ;;  %v1566_v15 = vrot.slane %v1564_v6, 4  ;;  %v1569_v13 = vrot.slane %v1567_v23, 5  ;;  %v2271_v24 = vpack.c.bf16 %v1017_v46, %v1017_v46  ;;  %v3567_v51 = vld [vmem:[#allocation18_spill] sm:$0xff]  ;;  %s247_s7 = scalar_lea.vmem [#allocation3], %s2063_s27 }
  0xfd   : > { %v2279_v63 = vpack.c.bf16 %v1025_v25, %v1025_v25  ;;  %v1496_v20 = vrot.slane %v1494_v2, 4  ;;  %v1499_v34 = vrot.slane %v1497_v55, 5  ;;  %v574_v12 = vunpack.c.l.bf16 %v2084_v4 }
  0xfe   : > { %v1552_v21 = vrot.slane %v1550_v29, 4  ;;  %v1555_v0 = vrot.slane %v1553_v36, 5  ;;  %v1517_v42 = vshll.u32 %v2273_v18, 16  ;;  %v1573_v32 = vshll.u32 %v2281_v11, 16 }
  0xff   : > { %v3566_v58 = vcombine.low %v3068_v62, %v3072_v28  ;;  %v3568_v17 = vcombine.low %v3567_v51, %v3046_v43  ;;  %v1514_v57 = vor.u32 %v1513_v50, %v1510_v54  ;;  %v1570_v31 = vor.u32 %v1569_v13, %v1566_v15 }
 0x100   : > { %1716 = vrot.lane.b32.xlu0 %v3562_v48, %s2495_s8  ;;  %1714 = vrot.lane.b32.xlu1 %v3565_v14, %s2495_s8  ;;  %v1503_v45 = vshll.u32 %v2271_v24, 16  ;;  %v1559_v3 = vshll.u32 %v2279_v63, 16  ;;  %v592_v53 = vmul.f32 %v3217_v10, %v574_v12  ;;  %v1500_v6 = vor.u32 %v1499_v34, %v1496_v20  ;;  %v2407_v12 = vld [vmem:[%s3507_s4 + $0x8] sm:$0xff]  }
 0x101   : > { %v1556_v23 = vor.u32 %v1555_v0, %v1552_v21  ;;  %v1519_v46 = vrot.slane %v1517_v42, 5  ;;  %v1575_v25 = vrot.slane %v1573_v32, 5  ;;  %v3569_v2 = vcombine.low %v3118_v8, %v3122_v59 }
 0x102   : > { %v3570_v55 = vcombine.low %v3096_v56, %v3100_v61  ;;  %v1515_v29 = vrot.slane %v1514_v57, 4  ;;  %v1571_v36 = vrot.slane %v1570_v31, 4  ;;  %v1505_v18 = vrot.slane %v1503_v45, 5 }
 0x103   : > { %v1561_v11 = vrot.slane %v1559_v3, 5  ;;  %v610_v4 = vadd.f32 %v3233_v22, %v592_v53  ;;  %v1501_v54 = vrot.slane %v1500_v6, 4  ;;  %v1557_v10 = vrot.slane %v1556_v23, 4  ;;  %v3578_v23 = vld [vmem:[#allocation7_spill] sm:$0xff] }
 0x104   : > { %1644 = vrot.lane.b32.xlu0 %v3566_v58, %s2496_s29  ;;  %1640 = vrot.lane.b32.xlu1 %v3568_v17, %s2496_s29  ;;  %v1576_v50 = vsel %vm3030_vm1, %v1571_v36, %v1575_v25  ;;  %v1520_v48 = vsel %vm3030_vm1, %v1515_v29, %v1519_v46  ;;  %v3571_v14 = vcombine.low %v3178_v7, %v3182_v37  ;;  %v2406_v7 = vld [vmem:[%s3507_s4] sm:$0xff]   ;;  %vm1769_vm9 = vcmask 97280  }
 0x105   : > { %v3572_v15 = vcombine.low %v3165_v47, %v3155_v30  ;;  %v1562_v22 = vsel %vm3030_vm1, %v1557_v10, %v1561_v11  ;;  %v1506_v13 = vsel %vm3030_vm1, %v1501_v54, %v1505_v18  ;;  %v646_v20 = vmul.f32 0.1, %v610_v4  ;;  %2316 = vmatprep.subr.bf16.mxu0 %v2406_v7  ;;  %2330 = vmatprep.subr.bf16.mxu1 %v2406_v7  ;;  %v768_v47 = vpop.permute.xlu0 %767 }
 0x106   : > { %v2225_v24 = vcombine.low %v1562_v22, %v1576_v50  ;;  %v2223_v63 = vcombine.low %v1506_v13, %v1520_v48  ;;  %vm628_vm6 = vcmp.gt.f32.partialorder %v610_v4, 0.0  ;;  %v2304_v30 = vpack.c.bf16 %v3225_v38, %v3190_v40  ;;  %2317 = vmatpush3.bf16.msra.mxu0 %v2406_v7  ;;  %2333 = vmatpush3.bf16.msra.mxu1 %v2406_v7 }
 0x107   : > { %v664_v37 = vsel %vm628_vm6, %v610_v4, %v646_v20  ;;  %v3574_v34 = vpack.c.bf16 %v3092_v9, %v3573_v44  ;;  %v2305_v40 = vpack.c.bf16 %v3200_v35, %v3223_v5  ;;  %v2306_v38 = vpack.c.bf16 %v3241_v33, %v3202_v39  ;;  %2318 = vmatprep.subr.bf16.mxu0 %v2407_v12  ;;  %v2408_v9 = vld [vmem:[%s3507_s4 + $0x10] ss:$0 sps:$4 sm:$0x33]  }
 0x108   : > { %1646 = vrot.lane.b32.xlu0 %v3569_v2, %s2496_s29  ;;  %1642 = vrot.lane.b32.xlu1 %v3570_v55, %s2496_s29  ;;  %v791_v21 = vmul.f32 %v768_v47, %v664_v37  ;;  %vm1869_vm1 = vcmask 1041408   ;;  %v3575_v35 = vcombine.low %v3046_v43, %v3096_v56  ;;  %v3576_v39 = vcombine.low %v3072_v28, %v3118_v8  ;;  %s1970_s29 = sshll.u32 %s247_s7, 4  ;;  %s3450_s29 = int_to_ptr.vmem [resolvable:$true] %s1970_s29 }
 0x109   : > { %2331 = vmatprep.subr.bf16.mxu1 %v2407_v12  ;;  %v1871_v42 = vsel %vm1869_vm1, %v2408_v9, 0  ;;  %v3577_v5 = vcombine.low %v3100_v61, %v3068_v62  ;;  %v3579_v46 = vpack.c.bf16 %v3558_v52, %v3578_v23  ;;  %v3580_v36 = vpack.c.bf16 %v3561_v1, %v3563_v49  ;;  %p2418_p1 = scmp.lt.s32.totalorder %s3450_s29, %s2416_s13 }
 0x10a   : > { %2319 = vmatpush3.bf16.msra.mxu0 %v2407_v12  ;;  %2334 = vmatpush3.bf16.msra.mxu1 %v2407_v12  ;;  %v2307_v0 = vpack.c.bf16 %v791_v21, %v3239_v41  ;;  %v3581_v11 = vpack.c.bf16 %v3564_v60, %v3557_v16  ;;  %vm1778_vm10 = vcmask 130048   ;;  %vm1787_vm11 = vcmask 162816  }
 0x10b   : > { %2336 = vmatprep.subr.msk.bf16.mxu0 %vm1869_vm1, %v2408_v9  ;;  %2337 = vmatprep.subr.msk.bf16.mxu1 %vm1869_vm1, %v2408_v9  ;;  %vm1796_vm12 = vcmask 195584   ;;  %vm1805_vm13 = vcmask 228352   ;;  %v3582_v22 = vpack.c.bf16 %v3573_v44, %v3560_v19  ;;  %vm1814_vm14 = vcmask 261120  }
 0x10c   : > { %1704 = vrot.lane.b32.xlu0 %v3571_v14, %s2497_s25  ;;  %1700 = vrot.lane.b32.xlu1 %v3572_v15, %s2497_s25  ;;  %vm1827_vm15 = vcmask 293888   ;;  %vm1946_vm0 = vcmask 60416  }
 0x10e   : > { %2321 = vmatpush3.bf16.msra.mxu0 %v1871_v42  ;;  %2335 = vmatpush3.bf16.msra.mxu1 %v1871_v42 }
 0x110   : > { %1706 = vrot.lane.b32.xlu0 %v2225_v24, %s2497_s25  ;;  %1702 = vrot.lane.b32.xlu1 %v2223_v63, %s2497_s25 }
 0x114   : > { %1718 = vrot.lane.b32.xlu0 %v3574_v34, %s2495_s8  ;;  %1726 = vrot.lane.b32.xlu1 %v2304_v30, %s2498_s11  ;;  %s2308_s8 = sshll.u32 %s2481_s21, 9  ;;  %s3456_s21 = scalar_lea.sflag [#allocation4], %s245_s24 }
 0x115   : > { %s3447_s10 = scalar_lea.hbm %s3508_s5, %s2308_s8 }
 0x118   : > { %1730 = vrot.lane.b32.xlu0 %v2306_v38, %s2498_s11  ;;  %1728 = vrot.lane.b32.xlu1 %v2305_v40, %s2498_s11 }
 0x11c   : > { %1732 = vrot.lane.b32.xlu0 %v2307_v0, %s2498_s11  ;;  %1739 = vrot.lane.b32.xlu1 %v3575_v35, %s2499_s17  ;;  %s2411_s11 = scalar_lea.vmem %s3450_s29, 512 }
 0x11d   : > { %p2412_p12 = scmp.ne.s32.totalorder %s3450_s29, %s2411_s11  ;;  %p2419_p2 = scmp.lt.s32.totalorder %s2417_s15, %s2411_s11 }
 0x11f   : > { %p2413_p13 = pnand %p2412_p12, %p2572_p4  ;;  %p2420_p3 = por %p2419_p2, %p2418_p1 }
 0x120   : > { %1743 = vrot.lane.b32.xlu0 %v3576_v39, %s2499_s17  ;;  %1741 = vrot.lane.b32.xlu1 %v3577_v5, %s2499_s17 }
 0x121   : > { %p2414_p0 = pneg %p2413_p13 }
 0x123   : > { %p2421_p5 = pnand %p2420_p3, %p2414_p0 }
 0x124   : > { %1745 = vrot.lane.b32.xlu0 %v2237_v27, %s2499_s17 }
 0x152   : > { %v1621_v41 = vpop.permute.xlu1 %1620 }
 0x153   : > { %v1750_v25 = vsel %vm1747_vm7, %v3579_v46, %v1621_v41 }
 0x156   : > { %v1625_v33 = vpop.permute.xlu0 %1624 }
 0x157   : > { %v1756_v18 = vsel %vm1747_vm7, %v3580_v36, %v1625_v33 }
 0x15a   : > { %v1623_v32 = vpop.permute.xlu1 %1622 }
 0x15b   : > { %v1753_v4 = vsel %vm1747_vm7, %v3581_v11, %v1623_v32 }
 0x15e   : > { %v1627_v58 = vpop.permute.xlu0 %1626  ;;  %v1653_v51 = vpop.permute.xlu1 %1652 }
 0x15f   : > { %v1759_v13 = vsel %vm1747_vm7, %v3582_v22, %v1627_v58 }
 0x162   : > { %v1657_v17 = vpop.permute.xlu0 %1656  ;;  %v1655_v43 = vpop.permute.xlu1 %1654 }
 0x166   : > { %v1659_v56 = vpop.permute.xlu0 %1658  ;;  %v1681_v57 = vpop.permute.xlu1 %1680 }
 0x16a   : > { %v1685_v31 = vpop.permute.xlu0 %1684  ;;  %v1683_v28 = vpop.permute.xlu1 %1682 }
 0x16e   : > { %v1687_v8 = vpop.permute.xlu0 %1686  ;;  %v1713_v45 = vpop.permute.xlu1 %1712 }
 0x172   : > { %v1717_v3 = vpop.permute.xlu0 %1716  ;;  %v1715_v62 = vpop.permute.xlu1 %1714 }
 0x176   : > { %v1645_v61 = vpop.permute.xlu0 %1644  ;;  %v1641_v53 = vpop.permute.xlu1 %1640 }
 0x177   : > { %v1762_v29 = vsel %vm1760_vm8, %v1750_v25, %v1641_v53  ;;  %v1766_v50 = vsel %vm1760_vm8, %v1756_v18, %v1645_v61 }
 0x178   : > { %v1771_v54 = vsel %vm1769_vm9, %v1762_v29, %v1653_v51  ;;  %v1775_v1 = vsel %vm1769_vm9, %v1766_v50, %v1657_v17 }
 0x179   : > { %v1780_v14 = vsel %vm1778_vm10, %v1771_v54, %v1681_v57  ;;  %v1784_v63 = vsel %vm1778_vm10, %v1775_v1, %v1685_v31 }
 0x17a   : > { %v1647_v6 = vpop.permute.xlu0 %1646  ;;  %v1643_v59 = vpop.permute.xlu1 %1642 }
 0x17b   : > { %v1764_v48 = vsel %vm1760_vm8, %v1753_v4, %v1643_v59  ;;  %v1768_v24 = vsel %vm1760_vm8, %v1759_v13, %v1647_v6 }
 0x17c   : > { %v1773_v49 = vsel %vm1769_vm9, %v1764_v48, %v1655_v43  ;;  %v1777_v12 = vsel %vm1769_vm9, %v1768_v24, %v1659_v56 }
 0x17d   : > { %v1782_v20 = vsel %vm1778_vm10, %v1773_v49, %v1683_v28  ;;  %v1786_v35 = vsel %vm1778_vm10, %v1777_v12, %v1687_v8 }
 0x17e   : > { %v1705_v26 = vpop.permute.xlu0 %1704  ;;  %v1701_v27 = vpop.permute.xlu1 %1700 }
 0x17f   : > { %v1789_v16 = vsel %vm1787_vm11, %v1780_v14, %v1701_v27  ;;  %v1793_v30 = vsel %vm1787_vm11, %v1784_v63, %v1705_v26 }
 0x180   : > { %v1798_v7 = vsel %vm1796_vm12, %v1789_v16, %v1713_v45  ;;  %v1802_v40 = vsel %vm1796_vm12, %v1793_v30, %v1717_v3 }
 0x182   : > { %v1707_v2 = vpop.permute.xlu0 %1706  ;;  %v1703_v55 = vpop.permute.xlu1 %1702 }
 0x183   : > { %v1791_v47 = vsel %vm1787_vm11, %v1782_v20, %v1703_v55  ;;  %v1795_v41 = vsel %vm1787_vm11, %v1786_v35, %v1707_v2 }
 0x184   : > { %v1800_v38 = vsel %vm1796_vm12, %v1791_v47, %v1715_v62 }
 0x186   : > { %v1719_v52 = vpop.permute.xlu0 %1718  ;;  %v1727_v10 = vpop.permute.xlu1 %1726 }
 0x187   : > { %v1807_v37 = vsel %vm1805_vm13, %v1798_v7, %v1727_v10  ;;  %v1804_v33 = vsel %vm1796_vm12, %v1795_v41, %v1719_v52 }
 0x18a   : > { %v1731_v60 = vpop.permute.xlu0 %1730  ;;  %v1729_v15 = vpop.permute.xlu1 %1728 }
 0x18b   : > { %v1811_v21 = vsel %vm1805_vm13, %v1802_v40, %v1731_v60  ;;  %v1809_v9 = vsel %vm1805_vm13, %v1800_v38, %v1729_v15 }
 0x18e   : > { %v1733_v34 = vpop.permute.xlu0 %1732  ;;  %v1740_v19 = vpop.permute.xlu1 %1739 }
 0x18f   : > { %v1816_v44 = vsel %vm1814_vm14, %v1807_v37, %v1740_v19  ;;  %v1813_v32 = vsel %vm1805_vm13, %v1804_v33, %v1733_v34 }
 0x190   : > { %1828 = vst.msk [vmem:[#allocation2] sm:$0xff] %vm1827_vm15, %v1816_v44 }
 0x192   : > { %v1744_v0 = vpop.permute.xlu0 %1743  ;;  %v1742_v42 = vpop.permute.xlu1 %1741 }
 0x193   : > { %v1822_v39 = vsel %vm1814_vm14, %v1811_v21, %v1744_v0  ;;  %v1819_v5 = vsel %vm1814_vm14, %v1809_v9, %v1742_v42 }
 0x194   : > { %1830 = vst.msk [vmem:[#allocation2 + $0x10] sm:$0xff] %vm1827_vm15, %v1822_v39  ;;  %1829 = vst.msk [vmem:[#allocation2 + $0x8] sm:$0xff] %vm1827_vm15, %v1819_v5 }
 0x196   : > { %v1746_v58 = vpop.permute.xlu0 %1745 }
 0x197   : > { %v1825_v51 = vsel %vm1814_vm14, %v1813_v32, %v1746_v58  ;;  %v1832_v17 = vld [vmem:[#allocation2] sm:$0xff] }
 0x198   : > { %1831 = vst.msk [vmem:[#allocation2 + $0x18] sm:$0xff] %vm1827_vm15, %v1825_v51  ;;  %2322 = vmatprep.mubr.msk.bf16.mxu0 %vm1827_vm15, %v1832_v17 }
 0x19b   : > { %v1833_v43 = vld [vmem:[#allocation2 + $0x8] sm:$0xff]  ;;  %v1834_v56 = vld [vmem:[#allocation2 + $0x10] sm:$0xff] }
 0x19c   : > { %2323 = vmatmul.mubr.msk.bf16.vlgmr.msra.gmra.mrb[0].mxu0 %vm1827_vm15, %v1833_v43  ;;  %2326 = vmatprep.mubr.msk.bf16.mxu1 %vm1827_vm15, %v1834_v56 }
 0x19f   : > { %v1835_v57 = vld [vmem:[#allocation2 + $0x18] sm:$0xff] }
 0x1a0   : > { %2327 = vmatmul.mubr.msk.bf16.vlgmr.msra.gmra.mrb[0].mxu1 %vm1827_vm15, %v1835_v57 }
 0x26f   : > { %v2324_v31 = vpop.f32.mrb[0].mxu0 }
 0x270   : > { %v1940_v28 = vpack.c.bf16 %v2324_v31, %v2324_v31  ;;  %v1907_v8 = vpop.f32.mrb[1].mxu0 }
 0x271   : > { %v1938_v45 = vpack.c.bf16 %v1907_v8, %v1907_v8  ;;  %v2325_v3 = vpop.f32.mrb[2].mxu0 }
 0x272   : > { %1949 = vst.msk [vmem:[%s247_s7 + $0x8] sm:$0xf] %vm1946_vm0, %v1940_v28  ;;  %v1941_v62 = vpack.c.bf16 %v2325_v3, %v2325_v3  ;;  %v1910_v61 = vpop.f32.mrb[3].mxu0 }
 0x273   : > { %1947 = vst.msk [vmem:[%s247_s7] sm:$0xf] %vm1946_vm0, %v1938_v45  ;;  %v1939_v53 = vpack.c.bf16 %v1910_v61, %v1910_v61  ;;  %v2328_v6 = vpop.f32.mrb[0].mxu1 }
 0x274   : > { %1950 = vst.msk [vmem:[%s247_s7 + $0xc] sm:$0xf] %vm1946_vm0, %v1941_v62  ;;  %v1944_v59 = vpack.c.bf16 %v2328_v6, %v2328_v6  ;;  %v1923_v26 = vpop.f32.mrb[1].mxu1 }
 0x275   : > { %1948 = vst.msk [vmem:[%s247_s7 + $0x4] sm:$0xf] %vm1946_vm0, %v1939_v53  ;;  %v1942_v27 = vpack.c.bf16 %v1923_v26, %v1923_v26  ;;  %v2329_v23 = vpop.f32.mrb[2].mxu1 }
 0x276   : > { %1953 = vst.msk [vmem:[%s247_s7 + $0x18] sm:$0xf] %vm1946_vm0, %v1944_v59  ;;  %v1945_v46 = vpack.c.bf16 %v2329_v23, %v2329_v23  ;;  %v1926_v25 = vpop.f32.mrb[3].mxu1 }
 0x277   : > { %1951 = vst.msk [vmem:[%s247_s7 + $0x10] sm:$0xf] %vm1946_vm0, %v1942_v27  ;;  %v1943_v2 = vpack.c.bf16 %v1926_v25, %v1926_v25 }
 0x278   : > { %1954 = vst.msk [vmem:[%s247_s7 + $0x1c] sm:$0xf] %vm1946_vm0, %v1945_v46 }
 0x279   : > { %1952 = vst.msk [vmem:[%s247_s7 + $0x14] sm:$0xf] %vm1946_vm0, %v1943_v2 }
 0x27a   : > { %2424 = shalt.err (!%p2421_p5)
}
 0x27b   : > { %s2425_s16 = scalar_lea.hbm %s3447_s10, 512  ;;  %s2429_s27 = scalar_lea.hbm %s3508_s5, 1024 }
 0x27c   : > { %p2426_p6 = scmp.ne.s32.totalorder %s3447_s10, %s2425_s16  ;;  %p2430_p10 = scmp.lt.u32.totalorder %s3447_s10, %s3508_s5 }
 0x27d   : > { %p2431_p11 = scmp.lt.u32.totalorder %s2429_s27, %s2425_s16  ;;  %p2433_p13 = scmp.lt.u32.totalorder %s2425_s16, %s3447_s10 }
 0x27e   : > { %p2427_p7 = pnand %p2426_p6, %p2572_p4 }
 0x27f   : > { %p2432_p12 = por %p2431_p11, %p2430_p10 }
 0x280   : > { %p2428_p9 = pneg %p2427_p7 }
 0x281   : > { %p2434_p0 = por %p2433_p13, %p2432_p12 }
 0x283   : > { %p2435_p1 = pnand %p2434_p0, %p2428_p9 }
 0x285   : > { %2438 = shalt.err (!%p2435_p1)
}
 0x286   : > { %s2501_s25 = smov 64  }
 0x287   : > { %2339 = dma.vmem_to_hbm [thread:$0]  (%p2572_p4), %s3450_s29, 512, %s3447_s10, %s3456_s21, %s2501_s25, %s2501_s25, %s2492_s14  }
 0x288 PF: > { %p2345_p2 = scmp.ge.s32.totalorder %s2489_s23, 2  ;;  %s1985_s9 = sand.u32 1, %s2469_s18  }
 0x289   : > { %s1986_s11 = scalar_lea.sflag [#allocation4], %s1985_s9 }
 0x28a   : > { %p2342_p3 = pnand %p2345_p2, %p2579_p8 }
 0x28c   : > { %2464 = dma.done.wait (!%p2342_p3), %s1986_s11, 512  }
 0x28d   : > { %2466 = vsyncadd (!%p2342_p3), %s1986_s11, 4294966784  ;;  %s18_s23 = sadd.s32 1, %s2489_s23   ;;  %s3583_s18 = smov %s2473_s19 }
 0x28e   : > { %p15_p5 = scmp.ge.s32.totalorder %s18_s23, 4   ;;  %s3584_s19 = smov %s2477_s20 }
 0x28f   : > { %s3585_s20 = smov %s2585_s6  ;;  %s3586_s21 = smov %s2485_s22 }
 0x290   : > { %s3587_s22 = smov %s3589_s26  ;;  %17 = sbr.rel (!%p15_p5) target bundleno = 4 (0x4), region = 88 }
 0x297   :  { %1991 = vsyncpa [#allocation4], 1 }
 0x298   :  { %1993 = vsyncpa [#allocation4 + $0x1], 1 }

</bundles_post_ra>
